<compile_context>
chip_gen: v7x
topology: tpu7x:2x2x1
jax: 0.10.0
libtpu: 0.0.40
codegen_flags: <defaults>
</compile_context>

<pallas_src>
import functools

import jax
import jax.numpy as jnp
from jax.experimental import pallas as pl
from jax.experimental.pallas import tpu as pltpu


def _round_up(x, m):
    return (x + m - 1) // m * m


def _vmem_capacity_bytes():
    """Physical VMEM per core; conservative 64 MiB (v7x) fallback."""
    try:
        return int(pltpu.get_tpu_info().vmem_capacity_bytes)
    except Exception:
        return 64 * 1024 * 1024


def _default_tile_rows():
    """Row tile: 128 on v5e (4x128^2 MXU), 256 on v6e/v7x (2x256^2 MXU)."""
    try:
        kind = jax.devices()[0].device_kind.lower()
    except Exception:
        kind = ""
    if "v5e" in kind or "v5 lite" in kind or "v5lite" in kind:
        return 128
    return 256


# --------------------------------------------------------------------------
# Kernels
# --------------------------------------------------------------------------
def _fused_resident_kernel(a_ref, x_ref, w1_ref, b1_ref, w2_ref, b2_ref,
                           out_ref):
    """Both GCN layers in one grid step; every operand resident in VMEM."""
    a = a_ref[...]
    # Layer 1: h = relu(A @ (X @ W1) + b1)
    s1 = jnp.dot(x_ref[...], w1_ref[...], preferred_element_type=jnp.float32)
    h = jnp.maximum(
        jnp.dot(a, s1.astype(jnp.bfloat16), preferred_element_type=jnp.float32)
        + b1_ref[...], 0.0)
    # Layer 2: logits = A @ (h @ W2) + b2
    s2 = jnp.dot(h.astype(jnp.bfloat16), w2_ref[...],
                 preferred_element_type=jnp.float32)
    logits = jnp.dot(a, s2.astype(jnp.bfloat16),
                     preferred_element_type=jnp.float32) + b2_ref[...]
    out_ref[...] = logits.astype(out_ref.dtype)


def _support_kernel(x_ref, w_ref, s_ref):
    """support_tile = X_tile @ W (bf16 out, f32 accumulate)."""
    s_ref[...] = jnp.dot(x_ref[...], w_ref[...],
                         preferred_element_type=jnp.float32).astype(s_ref.dtype)


def _aggregate_kernel(a_ref, s_ref, b_ref, o_ref, *, relu):
    """out_tile = act(A_tile @ support + b)."""
    acc = jnp.dot(a_ref[...], s_ref[...], preferred_element_type=jnp.float32)
    acc = acc + b_ref[...]
    if relu:
        acc = jnp.maximum(acc, 0.0)
    o_ref[...] = acc.astype(o_ref.dtype)


def _agg_first_kernel(a_ref, x_ref, w_ref, b_ref, o_ref, *, relu):
    """out_tile = act((A_tile @ X) @ W + b) — used when d_out > d_in."""
    ax = jnp.dot(a_ref[...], x_ref[...], preferred_element_type=jnp.float32)
    acc = jnp.dot(ax.astype(jnp.bfloat16), w_ref[...],
                  preferred_element_type=jnp.float32) + b_ref[...]
    if relu:
        acc = jnp.maximum(acc, 0.0)
    o_ref[...] = acc.astype(o_ref.dtype)


# --------------------------------------------------------------------------
# pallas_call wrappers
# --------------------------------------------------------------------------
def _fused_forward(a, x, w1, b1, w2, b2, *, vmem_limit):
    n_pad = a.shape[0]
    d_pad = x.shape[1]
    h_pad = w1.shape[1]
    c_pad = w2.shape[1]
    flops = 2 * n_pad * (d_pad * h_pad + n_pad * h_pad
                         + h_pad * c_pad + n_pad * c_pad)
    bytes_accessed = (n_pad * n_pad * 2 + n_pad * d_pad * 2
                      + d_pad * h_pad * 2 + h_pad * c_pad * 2
                      + (h_pad + c_pad) * 4 + n_pad * c_pad * 4)
    return pl.pallas_call(
        _fused_resident_kernel,
        out_shape=jax.ShapeDtypeStruct((n_pad, c_pad), jnp.float32),
        grid_spec=pltpu.PrefetchScalarGridSpec(
            num_scalar_prefetch=0,
            grid=(1,),
            in_specs=[
                pl.BlockSpec((n_pad, n_pad), lambda i: (0, 0)),   # A (read once)
                pl.BlockSpec((n_pad, d_pad), lambda i: (0, 0)),   # X
                pl.BlockSpec((d_pad, h_pad), lambda i: (0, 0)),   # W1
                pl.BlockSpec((1, h_pad), lambda i: (0, 0)),       # b1
                pl.BlockSpec((h_pad, c_pad), lambda i: (0, 0)),   # W2
                pl.BlockSpec((1, c_pad), lambda i: (0, 0)),       # b2
            ],
            out_specs=pl.BlockSpec((n_pad, c_pad), lambda i: (0, 0)),
        ),
        compiler_params=pltpu.CompilerParams(
            dimension_semantics=("arbitrary",),
            vmem_limit_bytes=vmem_limit),
        cost_estimate=pl.CostEstimate(flops=flops, transcendentals=0,
                                      bytes_accessed=bytes_accessed),
    )(a, x, w1, b1, w2, b2)


def _graph_conv_tiled(a, x, w, b, *, relu, tm, out_dtype, vmem_limit):
    """One GraphConvolution layer act(A @ (X @ W) + b), row-tiled & parallel."""
    n_pad = a.shape[0]
    d_in = x.shape[1]
    d_out = w.shape[1]
    n_tiles = n_pad // tm
    out_isz = jnp.dtype(out_dtype).itemsize
    cparams = pltpu.CompilerParams(dimension_semantics=("parallel",),
                                   vmem_limit_bytes=vmem_limit)

    if d_out <= d_in:
        # support-first: the N^2-scale aggregation matmul is only d_out wide.
        support = pl.pallas_call(
            _support_kernel,
            out_shape=jax.ShapeDtypeStruct((n_pad, d_out), jnp.bfloat16),
            grid_spec=pltpu.PrefetchScalarGridSpec(
                num_scalar_prefetch=0,
                grid=(n_tiles,),
                in_specs=[pl.BlockSpec((tm, d_in), lambda i: (i, 0)),
                          pl.BlockSpec((d_in, d_out), lambda i: (0, 0))],
                out_specs=pl.BlockSpec((tm, d_out), lambda i: (i, 0))),
            compiler_params=cparams,
            cost_estimate=pl.CostEstimate(
                flops=2 * n_pad * d_in * d_out, transcendentals=0,
                bytes_accessed=(n_pad * d_in + d_in * d_out + n_pad * d_out) * 2),
        )(x, w)

        return pl.pallas_call(
            functools.partial(_aggregate_kernel, relu=relu),
            out_shape=jax.ShapeDtypeStruct((n_pad, d_out), out_dtype),
            grid_spec=pltpu.PrefetchScalarGridSpec(
                num_scalar_prefetch=0,
                grid=(n_tiles,),
                in_specs=[pl.BlockSpec((tm, n_pad), lambda i: (i, 0)),     # A row tile
                          pl.BlockSpec((n_pad, d_out), lambda i: (0, 0)),  # support (resident)
                          pl.BlockSpec((1, d_out), lambda i: (0, 0))],     # bias
                out_specs=pl.BlockSpec((tm, d_out), lambda i: (i, 0))),
            compiler_params=cparams,
            cost_estimate=pl.CostEstimate(
                flops=2 * n_pad * n_pad * d_out, transcendentals=0,
                bytes_accessed=(n_pad * n_pad * 2 + n_pad * d_out * 2
                                + d_out * 4 + n_pad * d_out * out_isz)),
        )(a, support, b)

    # aggregate-first: the N^2-scale matmul stays d_in wide.
    return pl.pallas_call(
        functools.partial(_agg_first_kernel, relu=relu),
        out_shape=jax.ShapeDtypeStruct((n_pad, d_out), out_dtype),
        grid_spec=pltpu.PrefetchScalarGridSpec(
            num_scalar_prefetch=0,
            grid=(n_tiles,),
            in_specs=[pl.BlockSpec((tm, n_pad), lambda i: (i, 0)),     # A row tile
                      pl.BlockSpec((n_pad, d_in), lambda i: (0, 0)),   # X (resident)
                      pl.BlockSpec((d_in, d_out), lambda i: (0, 0)),   # W
                      pl.BlockSpec((1, d_out), lambda i: (0, 0))],     # bias
            out_specs=pl.BlockSpec((tm, d_out), lambda i: (i, 0))),
        compiler_params=cparams,
        cost_estimate=pl.CostEstimate(
            flops=2 * n_pad * (n_pad * d_in + d_in * d_out), transcendentals=0,
            bytes_accessed=(n_pad * n_pad * 2 + n_pad * d_in * 2
                            + d_in * d_out * 2 + d_out * 4
                            + n_pad * d_out * out_isz)),
    )(a, x, w, b)


# --------------------------------------------------------------------------
# Public forward
# --------------------------------------------------------------------------
def gcn_net_forward(adjacency, feature, params, *, force_tiled=False,
                    tile_rows=None):
    """GcnNet.forward: logits = A @ (relu(A @ (X @ W1) + b1) @ W2) + b2."""
    n = adjacency.shape[0]
    d = feature.shape[1]
    h_dim = params["w1"].shape[1]
    c_dim = params["w2"].shape[1]

    vmem_cap = _vmem_capacity_bytes()
    vmem_limit = int(0.8 * vmem_cap)      # ~51 MB on v7x, ~102 MB on v5e/v6e

    tm = tile_rows if tile_rows is not None else _default_tile_rows()
    tm = max(128, _round_up(int(tm), 128))

    d_pad = _round_up(d, 128)
    h_pad = _round_up(h_dim, 128)
    c_pad = _round_up(c_dim, 128)

    # Fused-resident path if A plus everything else (with slack for f32
    # intermediates and double-buffering) comfortably fits in VMEM.
    n_fused = _round_up(n, 128)
    fused_bytes = (n_fused * n_fused * 2
                   + n_fused * d_pad * 2
                   + d_pad * h_pad * 2 + h_pad * c_pad * 2
                   + (h_pad + c_pad) * 4
                   + n_fused * c_pad * 4
                   + n_fused * (h_pad + c_pad) * 8)
    use_fused = (not force_tiled) and (2 * fused_bytes <= vmem_limit)

    n_pad = n_fused if use_fused else _round_up(n, tm)

    # Zero-pad and cast MXU operands to bf16 (f32 accumulation in-kernel).
    a = jnp.zeros((n_pad, n_pad), jnp.bfloat16)
    a = a.at[:n, :n].set(adjacency.astype(jnp.bfloat16))
    x = jnp.zeros((n_pad, d_pad), jnp.bfloat16)
    x = x.at[:n, :d].set(feature.astype(jnp.bfloat16))
    w1 = jnp.zeros((d_pad, h_pad), jnp.bfloat16)
    w1 = w1.at[:d, :h_dim].set(params["w1"].astype(jnp.bfloat16))
    b1 = jnp.zeros((1, h_pad), jnp.float32)
    b1 = b1.at[0, :h_dim].set(params["b1"].astype(jnp.float32))
    w2 = jnp.zeros((h_pad, c_pad), jnp.bfloat16)
    w2 = w2.at[:h_dim, :c_dim].set(params["w2"].astype(jnp.bfloat16))
    b2 = jnp.zeros((1, c_pad), jnp.float32)
    b2 = b2.at[0, :c_dim].set(params["b2"].astype(jnp.float32))

    if use_fused:
        logits = _fused_forward(a, x, w1, b1, w2, b2, vmem_limit=vmem_limit)
    else:
        # h makes a cheap bf16 HBM round trip; both calls row-parallel.
        h = _graph_conv_tiled(a, x, w1, b1, relu=True, tm=tm,
                              out_dtype=jnp.bfloat16, vmem_limit=vmem_limit)
        logits = _graph_conv_tiled(a, h, w2, b2, relu=False, tm=tm,
                                   out_dtype=jnp.float32, vmem_limit=vmem_limit)

    return logits[:n, :c_dim]


def init_params(key, input_dim, hidden_channels=64, num_classes=2):
    """kaiming_uniform_ weights (fan_in = shape[1], as torch computes) + zero biases."""
    k1, k2 = jax.random.split(key)

    def kaiming_uniform(k, shape):
        fan_in = shape[1]
        bound = jnp.sqrt(6.0 / fan_in)
        return jax.random.uniform(k, shape, jnp.float32, -bound, bound)

    return {
        "w1": kaiming_uniform(k1, (input_dim, hidden_channels)),
        "b1": jnp.zeros((hidden_channels,), jnp.float32),
        "w2": kaiming_uniform(k2, (hidden_channels, num_classes)),
        "b2": jnp.zeros((num_classes,), jnp.float32),
    }


if __name__ == "__main__":
    key = jax.random.PRNGKey(0)
    k_adj, k_feat, k_w, k_b1, k_b2 = jax.random.split(key, 5)

    num_nodes = 500          # pads to 512
    input_dim = 32
    num_classes = 2

    # Synthetic dense adjacency (self-loops, row-normalized) and node features.
    adj_raw = (jax.random.uniform(k_adj, (num_nodes, num_nodes)) > 0.9
               ).astype(jnp.float32)
    adj = adj_raw + jnp.eye(num_nodes, dtype=jnp.float32)
    adj = adj / jnp.sum(adj, axis=1, keepdims=True)
    feature = jax.random.normal(k_feat, (num_nodes, input_dim), jnp.float32)

    def reference(adj, feature, p):
        # Same bf16-operand / f32-accumulate quantization as the kernels.
        q = lambda v: v.astype(jnp.bfloat16).astype(jnp.float32)
        h = jnp.maximum(q(adj) @ q(q(feature) @ q(p["w1"])) + p["b1"], 0.0)
        return q(adj) @ q(q(h) @ q(p["w2"])) + p["b2"]

    # (name, hidden_channels, force_tiled, tile_rows)
    cases = [
        ("fused-resident", 64, False, None),        # single step, A read once
        ("row-tiled", 64, True, 128),               # parallel row tiles
        ("row-tiled-wide-hidden", 160, True, 128),  # exercises (A@X)@W path
    ]
    for name, hidden, force_tiled, tile_rows in cases:
        params = init_params(k_w, input_dim, hidden_channels=hidden,
                             num_classes=num_classes)
        # Non-zero biases so the bias path is actually checked numerically.
        params["b1"] = 0.1 * jax.random.normal(k_b1, (hidden,), jnp.float32)
        params["b2"] = 0.1 * jax.random.normal(k_b2, (num_classes,), jnp.float32)

        fwd = jax.jit(functools.partial(gcn_net_forward,
                                        force_tiled=force_tiled,
                                        tile_rows=tile_rows))
        logits = jax.block_until_ready(fwd(adj, feature, params))
        assert logits.shape == (num_nodes, num_classes), (name, logits.shape)

        err = float(jnp.max(jnp.abs(logits - reference(adj, feature, params))))
        assert err < 3e-2, (name, err)

    print("KERNEL_OK")
</pallas_src>

<mosaic_0001>
module attributes {stable_mosaic.version = 11 : i64} {
  func.func @_fused_resident_kernel(%arg0: i32, %arg1: memref<512x512xbf16, #tpu.memory_space<vmem>>, %arg2: memref<512x128xbf16, #tpu.memory_space<vmem>>, %arg3: memref<128x128xbf16, #tpu.memory_space<vmem>>, %arg4: memref<1x128xf32, #tpu.memory_space<vmem>>, %arg5: memref<128x128xbf16, #tpu.memory_space<vmem>>, %arg6: memref<1x128xf32, #tpu.memory_space<vmem>>, %arg7: memref<512x128xf32, #tpu.memory_space<vmem>>) attributes {dimension_semantics = [#tpu.dimension_semantics<arbitrary>], iteration_bounds = array<i64: 1>, scalar_prefetch = 0 : i64, scratch_operands = 0 : i64, tpu.core_type = #tpu.core_type<tc>, window_params = [{pipeline_mode = #tpu.pipeline_mode<synchronous>, transform_indices = @transform_0, window_bounds = array<i64: 512, 512>}, {pipeline_mode = #tpu.pipeline_mode<synchronous>, transform_indices = @transform_1, window_bounds = array<i64: 512, 128>}, {pipeline_mode = #tpu.pipeline_mode<synchronous>, transform_indices = @transform_2, window_bounds = array<i64: 128, 128>}, {pipeline_mode = #tpu.pipeline_mode<synchronous>, transform_indices = @transform_3, window_bounds = array<i64: 1, 128>}, {pipeline_mode = #tpu.pipeline_mode<synchronous>, transform_indices = @transform_4, window_bounds = array<i64: 128, 128>}, {pipeline_mode = #tpu.pipeline_mode<synchronous>, transform_indices = @transform_5, window_bounds = array<i64: 1, 128>}, {pipeline_mode = #tpu.pipeline_mode<synchronous>, transform_indices = @transform_6, window_bounds = array<i64: 512, 128>}]} {
    %c0 = arith.constant 0 : index
    %c0_0 = arith.constant 0 : index
    %0 = vector.load %arg1[%c0, %c0_0] : memref<512x512xbf16, #tpu.memory_space<vmem>>, vector<512x512xbf16>
    %c0_1 = arith.constant 0 : index
    %c0_2 = arith.constant 0 : index
    %1 = vector.load %arg2[%c0_1, %c0_2] : memref<512x128xbf16, #tpu.memory_space<vmem>>, vector<512x128xbf16>
    %c0_3 = arith.constant 0 : index
    %c0_4 = arith.constant 0 : index
    %2 = vector.load %arg3[%c0_3, %c0_4] : memref<128x128xbf16, #tpu.memory_space<vmem>>, vector<128x128xbf16>
    %cst = arith.constant dense<0.000000e+00> : vector<512x128xf32>
    %3 = tpu.matmul %1, %2, %cst {dimension_numbers = #tpu.dot_dimension_numbers<[1], [0], [0], [1], [0, 0, 1, 1], [], []>} : vector<512x128xbf16>, vector<128x128xbf16>, vector<512x128xf32> -> vector<512x128xf32>
    %4 = arith.truncf %3 : vector<512x128xf32> to vector<512x128xbf16>
    %cst_5 = arith.constant dense<0.000000e+00> : vector<512x128xf32>
    %5 = tpu.matmul %0, %4, %cst_5 {dimension_numbers = #tpu.dot_dimension_numbers<[1], [0], [0], [1], [0, 0, 1, 1], [], []>} : vector<512x512xbf16>, vector<512x128xbf16>, vector<512x128xf32> -> vector<512x128xf32>
    %c0_6 = arith.constant 0 : index
    %c0_7 = arith.constant 0 : index
    %6 = vector.load %arg4[%c0_6, %c0_7] : memref<1x128xf32, #tpu.memory_space<vmem>>, vector<1x128xf32>
    %7 = vector.broadcast %6 : vector<1x128xf32> to vector<512x128xf32>
    %8 = arith.addf %5, %7 : vector<512x128xf32>
    %cst_8 = arith.constant 0.000000e+00 : f32
    %9 = vector.broadcast %cst_8 : f32 to vector<512x128xf32>
    %10 = arith.maximumf %8, %9 : vector<512x128xf32>
    %11 = arith.truncf %10 : vector<512x128xf32> to vector<512x128xbf16>
    %c0_9 = arith.constant 0 : index
    %c0_10 = arith.constant 0 : index
    %12 = vector.load %arg5[%c0_9, %c0_10] : memref<128x128xbf16, #tpu.memory_space<vmem>>, vector<128x128xbf16>
    %cst_11 = arith.constant dense<0.000000e+00> : vector<512x128xf32>
    %13 = tpu.matmul %11, %12, %cst_11 {dimension_numbers = #tpu.dot_dimension_numbers<[1], [0], [0], [1], [0, 0, 1, 1], [], []>} : vector<512x128xbf16>, vector<128x128xbf16>, vector<512x128xf32> -> vector<512x128xf32>
    %14 = arith.truncf %13 : vector<512x128xf32> to vector<512x128xbf16>
    %cst_12 = arith.constant dense<0.000000e+00> : vector<512x128xf32>
    %15 = tpu.matmul %0, %14, %cst_12 {dimension_numbers = #tpu.dot_dimension_numbers<[1], [0], [0], [1], [0, 0, 1, 1], [], []>} : vector<512x512xbf16>, vector<512x128xbf16>, vector<512x128xf32> -> vector<512x128xf32>
    %c0_13 = arith.constant 0 : index
    %c0_14 = arith.constant 0 : index
    %16 = vector.load %arg6[%c0_13, %c0_14] : memref<1x128xf32, #tpu.memory_space<vmem>>, vector<1x128xf32>
    %17 = vector.broadcast %16 : vector<1x128xf32> to vector<512x128xf32>
    %18 = arith.addf %15, %17 : vector<512x128xf32>
    %c0_15 = arith.constant 0 : index
    %c0_16 = arith.constant 0 : index
    %19 = vector.load %arg7[%c0_15, %c0_16] : memref<512x128xf32, #tpu.memory_space<vmem>>, vector<512x128xf32>
    tpu.vector_store %arg7[%c0_15, %c0_16], %18 {strides = array<i32>} : memref<512x128xf32, #tpu.memory_space<vmem>>, vector<512x128xf32>,
    return
  }
  func.func @transform_0(%arg0: i32) -> (i32, i32) {
    %c0_i32 = arith.constant 0 : i32
    %c0_i32_0 = arith.constant 0 : i32
    %c0_i32_1 = arith.constant 0 : i32
    return %c0_i32, %c0_i32_0 : i32, i32
  }
  func.func @transform_1(%arg0: i32) -> (i32, i32) {
    %c0_i32 = arith.constant 0 : i32
    %c0_i32_0 = arith.constant 0 : i32
    %c0_i32_1 = arith.constant 0 : i32
    return %c0_i32, %c0_i32_0 : i32, i32
  }
  func.func @transform_2(%arg0: i32) -> (i32, i32) {
    %c0_i32 = arith.constant 0 : i32
    %c0_i32_0 = arith.constant 0 : i32
    %c0_i32_1 = arith.constant 0 : i32
    return %c0_i32, %c0_i32_0 : i32, i32
  }
  func.func @transform_3(%arg0: i32) -> (i32, i32) {
    %c0_i32 = arith.constant 0 : i32
    %c0_i32_0 = arith.constant 0 : i32
    %c0_i32_1 = arith.constant 0 : i32
    return %c0_i32, %c0_i32_0 : i32, i32
  }
  func.func @transform_4(%arg0: i32) -> (i32, i32) {
    %c0_i32 = arith.constant 0 : i32
    %c0_i32_0 = arith.constant 0 : i32
    %c0_i32_1 = arith.constant 0 : i32
    return %c0_i32, %c0_i32_0 : i32, i32
  }
  func.func @transform_5(%arg0: i32) -> (i32, i32) {
    %c0_i32 = arith.constant 0 : i32
    %c0_i32_0 = arith.constant 0 : i32
    %c0_i32_1 = arith.constant 0 : i32
    return %c0_i32, %c0_i32_0 : i32, i32
  }
  func.func @transform_6(%arg0: i32) -> (i32, i32) {
    %c0_i32 = arith.constant 0 : i32
    %c0_i32_0 = arith.constant 0 : i32
    %c0_i32_1 = arith.constant 0 : i32
    return %c0_i32, %c0_i32_0 : i32, i32
  }
}

</mosaic_0001>

<bundles_post_ra>
// kernel: gcn_net_forward.1
= control target key start
LH: loop header
LB: loop body
LE: loop exit
PB: predicated region body
PF: predicated region fallthrough
CT: control target
= control target key end

     0   :  { %v4323_v32 = vmov 0   ;;  %s5665_s2 = inlined_call_operand.vmem [shape: bf16[128,128], index: 2, kind: input, shape index: {}]   ;;  %s5666_s1 = inlined_call_operand.vmem [shape: bf16[512,128], index: 1, kind: input, shape index: {}]   ;;  %s5667_s0 = inlined_call_operand.vmem [shape: bf16[512,512], index: 0, kind: input, shape index: {}]   ;;  %s5668_s4 = inlined_call_operand.vmem [shape: bf16[128,128], index: 4, kind: input, shape index: {}]   ;;  %s5669_s3 = inlined_call_operand.vmem [shape: f32[1,128], index: 3, kind: input, shape index: {}]   ;;  %s5670_s5 = inlined_call_operand.vmem [shape: f32[1,128], index: 5, kind: input, shape index: {}]   ;;  %s5671_s6 = inlined_call_operand.vmem [shape: f32[512,128], index: 6, kind: output, shape index: {}]  }
   0x1   :  { %v3955_v0 = vld [vmem:[%s5665_s2] sm:$0xff]   ;;  %v3956_v1 = vld [vmem:[%s5665_s2 + $0x8] sm:$0xff]   ;;  %v3957_v2 = vld [vmem:[%s5665_s2 + $0x10] sm:$0xff]  }
   0x2   :  { %3410 = vmatprep.subr.bf16.mxu1 %v3955_v0  ;;  %v3958_v3 = vld [vmem:[%s5665_s2 + $0x18] sm:$0xff]   ;;  %v3963_v4 = vld [vmem:[%s5666_s1] sm:$0xff]   ;;  %v3960_v6 = vld [vmem:[%s5665_s2 + $0x28] sm:$0xff]  }
   0x3   :  { %3411 = vmatpush3.bf16.msra.mxu1 %v3955_v0  ;;  %3426 = vmatprep.mubr.bf16.mxu1 %v3963_v4  ;;  %v3959_v5 = vld [vmem:[%s5665_s2 + $0x20] sm:$0xff]   ;;  %v3961_v7 = vld [vmem:[%s5665_s2 + $0x30] sm:$0xff]   ;;  %v3962_v8 = vld [vmem:[%s5665_s2 + $0x38] sm:$0xff]  }
   0x4   :  { %3412 = vmatprep.subr.bf16.mxu1 %v3956_v1  ;;  %v3964_v9 = vld [vmem:[%s5666_s1 + $0x8] sm:$0xff]   ;;  %v3965_v10 = vld [vmem:[%s5666_s1 + $0x10] sm:$0xff]   ;;  %v3966_v11 = vld [vmem:[%s5666_s1 + $0x18] sm:$0xff]  }
   0x5   :  { %v3967_v12 = vld [vmem:[%s5666_s1 + $0x20] sm:$0xff]   ;;  %v3968_v13 = vld [vmem:[%s5666_s1 + $0x28] sm:$0xff]   ;;  %v3969_v14 = vld [vmem:[%s5666_s1 + $0x30] sm:$0xff]  }
   0x6   :  { %v3970_v15 = vld [vmem:[%s5666_s1 + $0x38] sm:$0xff]   ;;  %v3971_v16 = vld [vmem:[%s5666_s1 + $0x40] sm:$0xff]   ;;  %v3972_v17 = vld [vmem:[%s5666_s1 + $0x48] sm:$0xff]  }
   0x7   :  { %3413 = vmatpush3.bf16.msra.mxu1 %v3956_v1  ;;  %v3973_v18 = vld [vmem:[%s5666_s1 + $0x50] sm:$0xff]   ;;  %v3974_v19 = vld [vmem:[%s5666_s1 + $0x58] sm:$0xff]   ;;  %v3975_v20 = vld [vmem:[%s5666_s1 + $0x60] sm:$0xff]  }
   0x8   :  { %3414 = vmatprep.subr.bf16.mxu1 %v3957_v2  ;;  %v3976_v21 = vld [vmem:[%s5666_s1 + $0x68] sm:$0xff]   ;;  %v3977_v22 = vld [vmem:[%s5666_s1 + $0x70] sm:$0xff]   ;;  %v3978_v23 = vld [vmem:[%s5666_s1 + $0x78] sm:$0xff]  }
   0x9   :  { %v3979_v24 = vld [vmem:[%s5666_s1 + $0x80] sm:$0xff]   ;;  %v3980_v25 = vld [vmem:[%s5666_s1 + $0x88] sm:$0xff]   ;;  %v3981_v26 = vld [vmem:[%s5666_s1 + $0x90] sm:$0xff]  }
   0xa   :  { %v3982_v27 = vld [vmem:[%s5666_s1 + $0x98] sm:$0xff]   ;;  %v3983_v28 = vld [vmem:[%s5666_s1 + $0xa0] sm:$0xff]   ;;  %v3984_v29 = vld [vmem:[%s5666_s1 + $0xa8] sm:$0xff]  }
   0xb   :  { %3415 = vmatpush3.bf16.msra.mxu1 %v3957_v2  ;;  %v3985_v30 = vld [vmem:[%s5666_s1 + $0xb0] sm:$0xff]   ;;  %v3986_v31 = vld [vmem:[%s5666_s1 + $0xb8] sm:$0xff]   ;;  %v3987_v33 = vld [vmem:[%s5666_s1 + $0xc0] sm:$0xff]  }
   0xc   :  { %3416 = vmatprep.subr.bf16.mxu1 %v3958_v3  ;;  %v3988_v34 = vld [vmem:[%s5666_s1 + $0xc8] sm:$0xff]   ;;  %v3989_v35 = vld [vmem:[%s5666_s1 + $0xd0] sm:$0xff]   ;;  %v3990_v36 = vld [vmem:[%s5666_s1 + $0xd8] sm:$0xff]  }
   0xd   :  { %v3991_v37 = vld [vmem:[%s5666_s1 + $0xe0] sm:$0xff]   ;;  %v3992_v38 = vld [vmem:[%s5666_s1 + $0xe8] sm:$0xff]   ;;  %v3993_v39 = vld [vmem:[%s5666_s1 + $0xf0] sm:$0xff]  }
   0xe   :  { %v3994_v40 = vld [vmem:[%s5666_s1 + $0xf8] sm:$0xff]   ;;  %v3997_v41 = vld [vmem:[%s5667_s0 + $0x4] ss:$16 sps:$4 sm:$0xff]  }
   0xf   :  { %3417 = vmatpush3.bf16.msra.mxu1 %v3958_v3 }
  0x10   :  { %3418 = vmatprep.subr.bf16.mxu1 %v3959_v5 }
  0x13   :  { %3419 = vmatpush3.bf16.msra.mxu1 %v3959_v5 }
  0x14   :  { %3420 = vmatprep.subr.bf16.mxu1 %v3960_v6 }
  0x17   :  { %3421 = vmatpush3.bf16.msra.mxu1 %v3960_v6 }
  0x18   :  { %3422 = vmatprep.subr.bf16.mxu1 %v3961_v7 }
  0x1b   :  { %3423 = vmatpush3.bf16.msra.mxu1 %v3961_v7 }
  0x1c   :  { %3424 = vmatprep.subr.bf16.mxu1 %v3962_v8 }
  0x1f   :  { %3425 = vmatpush3.bf16.msra.mxu1 %v3962_v8 }
  0x20   :  { %1440 = vmatprep.subr.bf16.mxu1 %v4323_v32 }
  0x22   :  { %3427 = vmatmul.mubr.bf16.vlgmr.msra.gmra.mrb[0].mxu1 %v3964_v9 }
  0x23   :  { %3430 = vmatprep.mubr.bf16.mxu1 %v3965_v10 }
  0x2a   :  { %3431 = vmatmul.mubr.bf16.gmra.mrb[4].mxu1 %v3966_v11 }
  0x2b   :  { %3434 = vmatprep.mubr.bf16.mxu1 %v3967_v12 }
  0x32   :  { %3435 = vmatmul.mubr.bf16.gmra.mrb[8].mxu1 %v3968_v13 }
  0x33   :  { %3438 = vmatprep.mubr.bf16.mxu1 %v3969_v14 }
  0x3a   :  { %3439 = vmatmul.mubr.bf16.gmra.mrb[12].mxu1 %v3970_v15 }
  0x3b   :  { %3442 = vmatprep.mubr.bf16.mxu1 %v3971_v16 }
  0x42   :  { %3443 = vmatmul.mubr.bf16.gmra.mrb[16].mxu1 %v3972_v17 }
  0x43   :  { %3446 = vmatprep.mubr.bf16.mxu1 %v3973_v18 }
  0x4a   :  { %3447 = vmatmul.mubr.bf16.gmra.mrb[20].mxu1 %v3974_v19 }
  0x4b   :  { %3450 = vmatprep.mubr.bf16.mxu1 %v3975_v20 }
  0x52   :  { %3451 = vmatmul.mubr.bf16.gmra.mrb[24].mxu1 %v3976_v21 }
  0x53   :  { %3454 = vmatprep.mubr.bf16.mxu1 %v3977_v22 }
  0x5a   :  { %3455 = vmatmul.mubr.bf16.gmra.mrb[28].mxu1 %v3978_v23 }
  0x5b   :  { %3458 = vmatprep.mubr.bf16.mxu1 %v3979_v24 }
  0x62   :  { %3459 = vmatmul.mubr.bf16.gmra.mrb[32].mxu1 %v3980_v25 }
  0x63   :  { %3462 = vmatprep.mubr.bf16.mxu1 %v3981_v26 }
  0x6a   :  { %3463 = vmatmul.mubr.bf16.gmra.mrb[36].mxu1 %v3982_v27  ;;  %v3995_v27 = vld [vmem:[%s5667_s0] ss:$16 sps:$4 sm:$0xff]  }
  0x6b   :  { %3466 = vmatprep.mubr.bf16.mxu1 %v3983_v28 }
  0x72   :  { %3467 = vmatmul.mubr.bf16.gmra.mrb[40].mxu1 %v3984_v29  ;;  %v3998_v29 = vld [vmem:[%s5667_s0 + $0x24] ss:$16 sps:$4 sm:$0xff]  }
  0x73   :  { %3470 = vmatprep.mubr.bf16.mxu1 %v3985_v30 }
  0x7a   :  { %3471 = vmatmul.mubr.bf16.gmra.mrb[44].mxu1 %v3986_v31 }
  0x7b   :  { %3474 = vmatprep.mubr.bf16.mxu1 %v3987_v33 }
  0x82   :  { %3475 = vmatmul.mubr.bf16.gmra.mrb[48].mxu1 %v3988_v34 }
  0x83   :  { %3478 = vmatprep.mubr.bf16.mxu1 %v3989_v35 }
  0x8a   :  { %3479 = vmatmul.mubr.bf16.gmra.mrb[52].mxu1 %v3990_v36  ;;  %v4000_v36 = vld [vmem:[%s5667_s0 + $0x20] ss:$16 sps:$4 sm:$0xff]  }
  0x8b   :  { %3482 = vmatprep.mubr.bf16.mxu1 %v3991_v37 }
  0x92   :  { %3483 = vmatmul.mubr.bf16.gmra.mrb[56].mxu1 %v3992_v38  ;;  %v4001_v38 = vld [vmem:[%s5667_s0 + $0x44] ss:$16 sps:$4 sm:$0xff]  }
  0x93   :  { %3486 = vmatprep.mubr.bf16.mxu1 %v3993_v39 }
  0x9a   :  { %3487 = vmatmul.mubr.bf16.gmra.mrb[60].mxu1 %v3994_v40 }
  0x9b   :  { %1472 = vmatprep.mubr.bf16.mxu1 %v3997_v41 }
  0xf5   :  { %v3428_v42 = vpop.f32.mrb[0].mxu1 }
  0xf6   :  { %v506_v43 = vpop.f32.mrb[1].mxu1 }
  0xf7   :  { %v3429_v44 = vpop.f32.mrb[2].mxu1 }
  0xf8   :  { %v762_v45 = vpack.c.bf16 %v3429_v44, %v3428_v42  ;;  %v509_v46 = vpop.f32.mrb[3].mxu1  ;;  %v4003_v44 = vld [vmem:[%s5667_s0 + $0x40] ss:$16 sps:$4 sm:$0xff]  }
  0xf9   :  { %v761_v47 = vpack.c.bf16 %v509_v46, %v506_v43  ;;  %v4004_v46 = vld [vmem:[%s5667_s0 + $0x64] ss:$16 sps:$4 sm:$0xff]  }
  0xfb   :  { %1441 = vmatpush1.bf16.msra.mxu1 %v761_v47 }
  0xfc   :  { %1442 = vmatprep.subr.bf16.mxu1 %v4323_v32 }
  0xfd   :  { %v3432_v48 = vpop.f32.mrb[4].mxu1 }
  0xfe   :  { %v522_v49 = vpop.f32.mrb[5].mxu1 }
  0xff   :  { %v3433_v50 = vpop.f32.mrb[6].mxu1  ;;  %1443 = vmatpush1.bf16.msra.mxu1 %v762_v45 }
 0x100   :  { %v764_v51 = vpack.c.bf16 %v3433_v50, %v3432_v48  ;;  %v525_v52 = vpop.f32.mrb[7].mxu1  ;;  %1444 = vmatprep.subr.bf16.mxu1 %v4323_v32 }
 0x101   :  { %v763_v53 = vpack.c.bf16 %v525_v52, %v522_v49  ;;  %v4007_v52 = vld [vmem:[%s5667_s0 + $0x84] ss:$16 sps:$4 sm:$0xff]  }
 0x103   :  { %1445 = vmatpush1.bf16.msra.mxu1 %v763_v53 }
 0x104   :  { %1446 = vmatprep.subr.bf16.mxu1 %v4323_v32 }
 0x105   :  { %v3436_v54 = vpop.f32.mrb[8].mxu1 }
 0x106   :  { %v538_v55 = vpop.f32.mrb[9].mxu1 }
 0x107   :  { %v3437_v56 = vpop.f32.mrb[10].mxu1  ;;  %1447 = vmatpush1.bf16.msra.mxu1 %v764_v51  ;;  %v4006_v51 = vld [vmem:[%s5667_s0 + $0x60] ss:$16 sps:$4 sm:$0xff]  }
 0x108   :  { %v766_v57 = vpack.c.bf16 %v3437_v56, %v3436_v54  ;;  %v541_v58 = vpop.f32.mrb[11].mxu1  ;;  %1448 = vmatprep.subr.bf16.mxu1 %v4323_v32 }
 0x109   :  { %v765_v59 = vpack.c.bf16 %v541_v58, %v538_v55 }
 0x10b   :  { %1449 = vmatpush1.bf16.msra.mxu1 %v765_v59  ;;  %v4009_v59 = vld [vmem:[%s5667_s0 + $0x80] ss:$16 sps:$4 sm:$0xff]  }
 0x10c   :  { %1450 = vmatprep.subr.bf16.mxu1 %v4323_v32 }
 0x10d   :  { %v3440_v60 = vpop.f32.mrb[12].mxu1 }
 0x10e   :  { %v554_v61 = vpop.f32.mrb[13].mxu1 }
 0x10f   :  { %v3441_v62 = vpop.f32.mrb[14].mxu1  ;;  %1451 = vmatpush1.bf16.msra.mxu1 %v766_v57 }
 0x110   :  { %v768_v63 = vpack.c.bf16 %v3441_v62, %v3440_v60  ;;  %v557_v0 = vpop.f32.mrb[15].mxu1  ;;  %1452 = vmatprep.subr.bf16.mxu1 %v4323_v32  ;;  %v4010_v60 = vld [vmem:[%s5667_s0 + $0xa4] ss:$16 sps:$4 sm:$0xff]  }
 0x111   :  { %v767_v1 = vpack.c.bf16 %v557_v0, %v554_v61  ;;  %v4012_v61 = vld [vmem:[%s5667_s0 + $0xa0] ss:$16 sps:$4 sm:$0xff]   ;;  %v4013_v62 = vld [vmem:[%s5667_s0 + $0xc4] ss:$16 sps:$4 sm:$0xff]  }
 0x113   :  { %1453 = vmatpush1.bf16.msra.mxu1 %v767_v1  ;;  %v4016_v1 = vld [vmem:[%s5667_s0 + $0xe4] ss:$16 sps:$4 sm:$0xff]  }
 0x114   :  { %1454 = vmatprep.subr.bf16.mxu1 %v4323_v32 }
 0x115   :  { %v3444_v2 = vpop.f32.mrb[16].mxu1 }
 0x116   :  { %v570_v3 = vpop.f32.mrb[17].mxu1 }
 0x117   :  { %v3445_v4 = vpop.f32.mrb[18].mxu1  ;;  %1455 = vmatpush1.bf16.msra.mxu1 %v768_v63  ;;  %v4015_v63 = vld [vmem:[%s5667_s0 + $0xc0] ss:$16 sps:$4 sm:$0xff]  }
 0x118   :  { %v770_v5 = vpack.c.bf16 %v3445_v4, %v3444_v2  ;;  %v573_v6 = vpop.f32.mrb[19].mxu1  ;;  %1456 = vmatprep.subr.bf16.mxu1 %v4323_v32 }
 0x119   :  { %v769_v7 = vpack.c.bf16 %v573_v6, %v570_v3 }
 0x11b   :  { %1457 = vmatpush1.bf16.msra.mxu1 %v769_v7  ;;  %v4018_v7 = vld [vmem:[%s5667_s0 + $0xe0] ss:$16 sps:$4 sm:$0xff]  }
 0x11c   :  { %1458 = vmatprep.subr.bf16.mxu1 %v4323_v32 }
 0x11d   :  { %v3448_v8 = vpop.f32.mrb[20].mxu1 }
 0x11e   :  { %v586_v9 = vpop.f32.mrb[21].mxu1 }
 0x11f   :  { %v3449_v10 = vpop.f32.mrb[22].mxu1  ;;  %1459 = vmatpush1.bf16.msra.mxu1 %v770_v5 }
 0x120   :  { %v772_v11 = vpack.c.bf16 %v3449_v10, %v3448_v8  ;;  %v589_v12 = vpop.f32.mrb[23].mxu1  ;;  %1460 = vmatprep.subr.bf16.mxu1 %v4323_v32 }
 0x121   :  { %v771_v13 = vpack.c.bf16 %v589_v12, %v586_v9  ;;  %v4019_v9 = vld [vmem:[%s5667_s0 + $0x104] ss:$16 sps:$4 sm:$0xff]  }
 0x123   :  { %1461 = vmatpush1.bf16.msra.mxu1 %v771_v13 }
 0x124   :  { %1462 = vmatprep.subr.bf16.mxu1 %v4323_v32 }
 0x125   :  { %v3452_v14 = vpop.f32.mrb[24].mxu1 }
 0x126   :  { %v602_v15 = vpop.f32.mrb[25].mxu1 }
 0x127   :  { %v3453_v16 = vpop.f32.mrb[26].mxu1  ;;  %1463 = vmatpush1.bf16.msra.mxu1 %v772_v11 }
 0x128   :  { %v774_v17 = vpack.c.bf16 %v3453_v16, %v3452_v14  ;;  %v605_v18 = vpop.f32.mrb[27].mxu1  ;;  %1464 = vmatprep.subr.bf16.mxu1 %v4323_v32  ;;  %v4021_v14 = vld [vmem:[%s5667_s0 + $0x100] ss:$16 sps:$4 sm:$0xff]  }
 0x129   :  { %v773_v19 = vpack.c.bf16 %v605_v18, %v602_v15 }
 0x12b   :  { %1465 = vmatpush1.bf16.msra.mxu1 %v773_v19 }
 0x12c   :  { %1466 = vmatprep.subr.bf16.mxu1 %v4323_v32 }
 0x12d   :  { %v3456_v20 = vpop.f32.mrb[28].mxu1 }
 0x12e   :  { %v618_v21 = vpop.f32.mrb[29].mxu1 }
 0x12f   :  { %v3457_v22 = vpop.f32.mrb[30].mxu1  ;;  %1467 = vmatpush1.bf16.msra.mxu1 %v774_v17  ;;  %v4022_v17 = vld [vmem:[%s5667_s0 + $0x124] ss:$16 sps:$4 sm:$0xff]  }
 0x130   :  { %v776_v23 = vpack.c.bf16 %v3457_v22, %v3456_v20  ;;  %v621_v24 = vpop.f32.mrb[31].mxu1  ;;  %1468 = vmatprep.subr.bf16.mxu1 %v4323_v32  ;;  %v4024_v22 = vld [vmem:[%s5667_s0 + $0x120] ss:$16 sps:$4 sm:$0xff]  }
 0x131   :  { %v775_v25 = vpack.c.bf16 %v621_v24, %v618_v21 }
 0x133   :  { %1469 = vmatpush1.bf16.msra.mxu1 %v775_v25  ;;  %v4025_v25 = vld [vmem:[%s5667_s0 + $0x144] ss:$16 sps:$4 sm:$0xff]  }
 0x134   :  { %1470 = vmatprep.subr.bf16.mxu1 %v4323_v32 }
 0x135   :  { %v3460_v26 = vpop.f32.mrb[32].mxu1 }
 0x136   :  { %v634_v28 = vpop.f32.mrb[33].mxu1 }
 0x137   :  { %1471 = vmatpush1.bf16.msra.mxu1 %v776_v23  ;;  %v3461_v30 = vpop.f32.mrb[34].mxu1 }
 0x138   :  { %v778_v31 = vpack.c.bf16 %v3461_v30, %v3460_v26  ;;  %v637_v33 = vpop.f32.mrb[35].mxu1  ;;  %1729 = vmatprep.subr.bf16.mxu1 %v4323_v32  ;;  %v4027_v30 = vld [vmem:[%s5667_s0 + $0x140] ss:$16 sps:$4 sm:$0xff]  }
 0x139   :  { %v777_v34 = vpack.c.bf16 %v637_v33, %v634_v28  ;;  %v4028_v33 = vld [vmem:[%s5667_s0 + $0x164] ss:$16 sps:$4 sm:$0xff]  }
 0x13a   :  { %1473 = vmatmul.mubr.bf16.vlgmr.msra.gmra.mrb[64].mxu1 %v3995_v27 }
 0x13b   :  { %1480 = vmatprep.mubr.bf16.mxu1 %v3998_v29  ;;  %1730 = vmatpush1.bf16.msra.mxu1 %v777_v34  ;;  %v4030_v34 = vld [vmem:[%s5667_s0 + $0x160] ss:$16 sps:$4 sm:$0xff]  }
 0x13c   :  { %1731 = vmatprep.subr.bf16.mxu1 %v4323_v32 }
 0x13d   :  { %v3464_v35 = vpop.f32.mrb[36].mxu1 }
 0x13e   :  { %v650_v37 = vpop.f32.mrb[37].mxu1 }
 0x13f   :  { %1732 = vmatpush1.bf16.msra.mxu1 %v778_v31  ;;  %v3465_v39 = vpop.f32.mrb[38].mxu1 }
 0x140   :  { %v780_v40 = vpack.c.bf16 %v3465_v39, %v3464_v35  ;;  %v653_v41 = vpop.f32.mrb[39].mxu1  ;;  %1733 = vmatprep.subr.bf16.mxu1 %v4323_v32  ;;  %v4031_v35 = vld [vmem:[%s5667_s0 + $0x184] ss:$16 sps:$4 sm:$0xff]  }
 0x141   :  { %v779_v42 = vpack.c.bf16 %v653_v41, %v650_v37  ;;  %v4034_v37 = vld [vmem:[%s5667_s0 + $0x1a4] ss:$16 sps:$4 sm:$0xff]  }
 0x142   :  { %1481 = vmatmul.mubr.bf16.gmra.mrb[68].mxu1 %v4000_v36  ;;  %v4033_v36 = vld [vmem:[%s5667_s0 + $0x180] ss:$16 sps:$4 sm:$0xff]   ;;  %v4037_v39 = vld [vmem:[%s5667_s0 + $0x1c4] ss:$16 sps:$4 sm:$0xff]  }
 0x143   :  { %1488 = vmatprep.mubr.bf16.mxu1 %v4001_v38  ;;  %1734 = vmatpush1.bf16.msra.mxu1 %v779_v42  ;;  %v4036_v38 = vld [vmem:[%s5667_s0 + $0x1a0] ss:$16 sps:$4 sm:$0xff]   ;;  %v4040_v41 = vld [vmem:[%s5667_s0 + $0x1e4] ss:$16 sps:$4 sm:$0xff]  }
 0x144   :  { %1735 = vmatprep.subr.bf16.mxu1 %v4323_v32  ;;  %v4042_v42 = vld [vmem:[%s5667_s0 + $0x1e0] ss:$16 sps:$4 sm:$0xff]  }
 0x145   :  { %v3468_v43 = vpop.f32.mrb[40].mxu1 }
 0x146   :  { %v666_v45 = vpop.f32.mrb[41].mxu1 }
 0x147   :  { %1736 = vmatpush1.bf16.msra.mxu1 %v780_v40  ;;  %v3469_v47 = vpop.f32.mrb[42].mxu1  ;;  %v4039_v40 = vld [vmem:[%s5667_s0 + $0x1c0] ss:$16 sps:$4 sm:$0xff]  }
 0x148   :  { %v782_v48 = vpack.c.bf16 %v3469_v47, %v3468_v43  ;;  %v669_v49 = vpop.f32.mrb[43].mxu1  ;;  %1737 = vmatprep.subr.bf16.mxu1 %v4323_v32  ;;  %v4043_v43 = vld [vmem:[%s5667_s0 + $0x204] ss:$16 sps:$4 sm:$0xff]  }
 0x149   :  { %v781_v50 = vpack.c.bf16 %v669_v49, %v666_v45  ;;  %v4046_v45 = vld [vmem:[%s5667_s0 + $0x224] ss:$16 sps:$4 sm:$0xff]  }
 0x14a   :  { %1489 = vmatmul.mubr.bf16.gmra.mrb[72].mxu1 %v4003_v44  ;;  %v4045_v44 = vld [vmem:[%s5667_s0 + $0x200] ss:$16 sps:$4 sm:$0xff]   ;;  %v4049_v47 = vld [vmem:[%s5667_s0 + $0x244] ss:$16 sps:$4 sm:$0xff]  }
 0x14b   :  { %1496 = vmatprep.mubr.bf16.mxu1 %v4004_v46  ;;  %1738 = vmatpush1.bf16.msra.mxu1 %v781_v50  ;;  %v4048_v46 = vld [vmem:[%s5667_s0 + $0x220] ss:$16 sps:$4 sm:$0xff]   ;;  %v4052_v49 = vld [vmem:[%s5667_s0 + $0x264] ss:$16 sps:$4 sm:$0xff]  }
 0x14c   :  { %1739 = vmatprep.subr.bf16.mxu1 %v4323_v32  ;;  %v4054_v50 = vld [vmem:[%s5667_s0 + $0x260] ss:$16 sps:$4 sm:$0xff]  }
 0x14d   :  { %v3472_v53 = vpop.f32.mrb[44].mxu1 }
 0x14e   :  { %v682_v54 = vpop.f32.mrb[45].mxu1 }
 0x14f   :  { %1740 = vmatpush1.bf16.msra.mxu1 %v782_v48  ;;  %v3473_v55 = vpop.f32.mrb[46].mxu1  ;;  %v4051_v48 = vld [vmem:[%s5667_s0 + $0x240] ss:$16 sps:$4 sm:$0xff]  }
 0x150   :  { %1741 = vmatprep.subr.bf16.mxu1 %v4323_v32  ;;  %v784_v56 = vpack.c.bf16 %v3473_v55, %v3472_v53  ;;  %v685_v57 = vpop.f32.mrb[47].mxu1  ;;  %v4058_v53 = vld [vmem:[%s5667_s0 + $0x2a4] ss:$16 sps:$4 sm:$0xff]  }
 0x151   :  { %v783_v58 = vpack.c.bf16 %v685_v57, %v682_v54  ;;  %v4060_v54 = vld [vmem:[%s5667_s0 + $0x2a0] ss:$16 sps:$4 sm:$0xff]   ;;  %v4061_v55 = vld [vmem:[%s5667_s0 + $0x2c4] ss:$16 sps:$4 sm:$0xff]  }
 0x152   :  { %1497 = vmatmul.mubr.bf16.gmra.mrb[76].mxu1 %v4006_v51  ;;  %v4055_v51 = vld [vmem:[%s5667_s0 + $0x284] ss:$16 sps:$4 sm:$0xff]  }
 0x153   :  { %1504 = vmatprep.mubr.bf16.mxu1 %v4007_v52  ;;  %1742 = vmatpush1.bf16.msra.mxu1 %v783_v58  ;;  %v4057_v52 = vld [vmem:[%s5667_s0 + $0x280] ss:$16 sps:$4 sm:$0xff]   ;;  %v4064_v57 = vld [vmem:[%s5667_s0 + $0x2e4] ss:$16 sps:$4 sm:$0xff]  }
 0x154   :  { %1743 = vmatprep.subr.bf16.mxu1 %v4323_v32  ;;  %v4066_v58 = vld [vmem:[%s5667_s0 + $0x2e0] ss:$16 sps:$4 sm:$0xff]  }
 0x155   :  { %v3476_v0 = vpop.f32.mrb[48].mxu1 }
 0x156   :  { %v698_v2 = vpop.f32.mrb[49].mxu1 }
 0x157   :  { %1744 = vmatpush1.bf16.msra.mxu1 %v784_v56  ;;  %v3477_v3 = vpop.f32.mrb[50].mxu1  ;;  %v4063_v56 = vld [vmem:[%s5667_s0 + $0x2c0] ss:$16 sps:$4 sm:$0xff]  }
 0x158   :  { %1745 = vmatprep.subr.bf16.mxu1 %v4323_v32  ;;  %v701_v4 = vpop.f32.mrb[51].mxu1  ;;  %v786_v5 = vpack.c.bf16 %v3477_v3, %v3476_v0  ;;  %v4075_v0 = vld [vmem:[%s5667_s0 + $0x340] ss:$16 sps:$4 sm:$0xff]   ;;  %v4079_v3 = vld [vmem:[%s5667_s0 + $0x384] ss:$16 sps:$4 sm:$0xff]  }
 0x159   :  { %v785_v6 = vpack.c.bf16 %v701_v4, %v698_v2  ;;  %v4078_v2 = vld [vmem:[%s5667_s0 + $0x360] ss:$16 sps:$4 sm:$0xff]  }
 0x15a   :  { %1505 = vmatmul.mubr.bf16.gmra.mrb[80].mxu1 %v4009_v59  ;;  %v4067_v59 = vld [vmem:[%s5667_s0 + $0x304] ss:$16 sps:$4 sm:$0xff]   ;;  %v4081_v4 = vld [vmem:[%s5667_s0 + $0x380] ss:$16 sps:$4 sm:$0xff]  }
 0x15b   :  { %1512 = vmatprep.mubr.bf16.mxu1 %v4010_v60  ;;  %1746 = vmatpush1.bf16.msra.mxu1 %v785_v6  ;;  %v4069_v60 = vld [vmem:[%s5667_s0 + $0x300] ss:$16 sps:$4 sm:$0xff]  }
 0x15c   :  { %1747 = vmatprep.subr.bf16.mxu1 %v4323_v32  ;;  %v4084_v6 = vld [vmem:[%s5667_s0 + $0x3a0] ss:$16 sps:$4 sm:$0xff]  }
 0x15d   :  { %v3480_v8 = vpop.f32.mrb[52].mxu1 }
 0x15e   :  { %v714_v10 = vpop.f32.mrb[53].mxu1 }
 0x15f   :  { %1748 = vmatpush1.bf16.msra.mxu1 %v786_v5  ;;  %v3481_v11 = vpop.f32.mrb[54].mxu1  ;;  %v4082_v5 = vld [vmem:[%s5667_s0 + $0x3a4] ss:$16 sps:$4 sm:$0xff]  }
 0x160   :  { %v717_v12 = vpop.f32.mrb[55].mxu1  ;;  %1749 = vmatprep.subr.bf16.mxu1 %v4323_v32  ;;  %v788_v15 = vpack.c.bf16 %v3481_v11, %v3480_v8  ;;  %v4087_v8 = vld [vmem:[%s5667_s0 + $0x3c0] ss:$16 sps:$4 sm:$0xff]   ;;  %v4093_v11 = vld [vmem:[%s5667_s0 + $0xc] ss:$16 sps:$4 sm:$0xff]  }
 0x161   :  { %v787_v13 = vpack.c.bf16 %v717_v12, %v714_v10  ;;  %v4090_v10 = vld [vmem:[%s5667_s0 + $0x3e0] ss:$16 sps:$4 sm:$0xff]   ;;  %v4091_v12 = vld [vmem:[%s5667_s0 + $0x8] ss:$16 sps:$4 sm:$0xff]  }
 0x162   :  { %1513 = vmatmul.mubr.bf16.gmra.mrb[84].mxu1 %v4012_v61  ;;  %v4070_v61 = vld [vmem:[%s5667_s0 + $0x324] ss:$16 sps:$4 sm:$0xff]  }
 0x163   :  { %1520 = vmatprep.mubr.bf16.mxu1 %v4013_v62  ;;  %1750 = vmatpush1.bf16.msra.mxu1 %v787_v13  ;;  %v4072_v62 = vld [vmem:[%s5667_s0 + $0x320] ss:$16 sps:$4 sm:$0xff]   ;;  %v4094_v13 = vld [vmem:[%s5667_s0 + $0x2c] ss:$16 sps:$4 sm:$0xff]  }
 0x164   :  { %1751 = vmatprep.subr.bf16.mxu1 %v4323_v32 }
 0x165   :  { %v3484_v16 = vpop.f32.mrb[56].mxu1 }
 0x166   :  { %v730_v18 = vpop.f32.mrb[57].mxu1 }
 0x167   :  { %1752 = vmatpush1.bf16.msra.mxu1 %v788_v15  ;;  %v3485_v19 = vpop.f32.mrb[58].mxu1  ;;  %v4097_v15 = vld [vmem:[%s5667_s0 + $0x4c] ss:$16 sps:$4 sm:$0xff]  }
 0x168   :  { %v733_v20 = vpop.f32.mrb[59].mxu1  ;;  %1753 = vmatprep.subr.bf16.mxu1 %v4323_v32  ;;  %v790_v23 = vpack.c.bf16 %v3485_v19, %v3484_v16  ;;  %v4099_v16 = vld [vmem:[%s5667_s0 + $0x48] ss:$16 sps:$4 sm:$0xff]   ;;  %v4103_v19 = vld [vmem:[%s5667_s0 + $0x8c] ss:$16 sps:$4 sm:$0xff]  }
 0x169   :  { %v789_v21 = vpack.c.bf16 %v733_v20, %v730_v18  ;;  %v4102_v18 = vld [vmem:[%s5667_s0 + $0x68] ss:$16 sps:$4 sm:$0xff]  }
 0x16a   :  { %1521 = vmatmul.mubr.bf16.gmra.mrb[88].mxu1 %v4015_v63  ;;  %v4073_v63 = vld [vmem:[%s5667_s0 + $0x344] ss:$16 sps:$4 sm:$0xff]   ;;  %v4105_v20 = vld [vmem:[%s5667_s0 + $0x88] ss:$16 sps:$4 sm:$0xff]  }
 0x16b   :  { %1528 = vmatprep.mubr.bf16.mxu1 %v4016_v1  ;;  %1754 = vmatpush1.bf16.msra.mxu1 %v789_v21  ;;  %v4076_v1 = vld [vmem:[%s5667_s0 + $0x364] ss:$16 sps:$4 sm:$0xff]   ;;  %v4106_v21 = vld [vmem:[%s5667_s0 + $0xac] ss:$16 sps:$4 sm:$0xff]  }
 0x16c   :  { %1755 = vmatprep.subr.bf16.mxu1 %v4323_v32 }
 0x16d   :  { %v3488_v24 = vpop.f32.mrb[60].mxu1 }
 0x16e   :  { %v746_v26 = vpop.f32.mrb[61].mxu1 }
 0x16f   :  { %v3489_v27 = vpop.f32.mrb[62].mxu1  ;;  %1756 = vmatpush1.bf16.msra.mxu1 %v790_v23  ;;  %v4109_v23 = vld [vmem:[%s5667_s0 + $0xcc] ss:$16 sps:$4 sm:$0xff]  }
 0x170   :  { %v749_v28 = vpop.f32.mrb[63].mxu1  ;;  %1757 = vmatprep.subr.bf16.mxu1 %v4323_v32  ;;  %v792_v31 = vpack.c.bf16 %v3489_v27, %v3488_v24  ;;  %v4111_v24 = vld [vmem:[%s5667_s0 + $0xc8] ss:$16 sps:$4 sm:$0xff]   ;;  %v4115_v27 = vld [vmem:[%s5667_s0 + $0x10c] ss:$16 sps:$4 sm:$0xff]  }
 0x171   :  { %v791_v29 = vpack.c.bf16 %v749_v28, %v746_v26  ;;  %v4114_v26 = vld [vmem:[%s5667_s0 + $0xe8] ss:$16 sps:$4 sm:$0xff]  }
 0x172   :  { %1529 = vmatmul.mubr.bf16.gmra.mrb[92].mxu1 %v4018_v7  ;;  %v4085_v7 = vld [vmem:[%s5667_s0 + $0x3c4] ss:$16 sps:$4 sm:$0xff]   ;;  %v4117_v28 = vld [vmem:[%s5667_s0 + $0x108] ss:$16 sps:$4 sm:$0xff]  }
 0x173   :  { %1536 = vmatprep.mubr.bf16.mxu1 %v4019_v9  ;;  %1758 = vmatpush1.bf16.msra.mxu1 %v791_v29  ;;  %v4088_v9 = vld [vmem:[%s5667_s0 + $0x3e4] ss:$16 sps:$4 sm:$0xff]   ;;  %v4118_v29 = vld [vmem:[%s5667_s0 + $0x12c] ss:$16 sps:$4 sm:$0xff]  }
 0x174   :  { %1759 = vmatprep.subr.bf16.mxu1 %v4323_v32 }
 0x177   :  { %1760 = vmatpush1.bf16.msra.mxu1 %v792_v31  ;;  %v4120_v31 = vld [vmem:[%s5667_s0 + $0x128] ss:$16 sps:$4 sm:$0xff]  }
 0x17a   :  { %1537 = vmatmul.mubr.bf16.gmra.mrb[96].mxu1 %v4021_v14  ;;  %v4096_v14 = vld [vmem:[%s5667_s0 + $0x28] ss:$16 sps:$4 sm:$0xff]  }
 0x17b   :  { %1544 = vmatprep.mubr.bf16.mxu1 %v4022_v17  ;;  %v4100_v17 = vld [vmem:[%s5667_s0 + $0x6c] ss:$16 sps:$4 sm:$0xff]  }
 0x182   :  { %1545 = vmatmul.mubr.bf16.gmra.mrb[100].mxu1 %v4024_v22  ;;  %v4108_v22 = vld [vmem:[%s5667_s0 + $0xa8] ss:$16 sps:$4 sm:$0xff]  }
 0x183   :  { %1552 = vmatprep.mubr.bf16.mxu1 %v4025_v25  ;;  %v4112_v25 = vld [vmem:[%s5667_s0 + $0xec] ss:$16 sps:$4 sm:$0xff]  }
 0x18a   :  { %1553 = vmatmul.mubr.bf16.gmra.mrb[104].mxu1 %v4027_v30  ;;  %v4166_v30 = vld [vmem:[%s5668_s4] sm:$0xff]  }
 0x18b   :  { %1560 = vmatprep.mubr.bf16.mxu1 %v4028_v33  ;;  %v4121_v33 = vld [vmem:[%s5667_s0 + $0x14c] ss:$16 sps:$4 sm:$0xff]   ;;  %3490 = vmatprep.subr.bf16.mxu0 %v4166_v30 }
 0x18c   :  { %3491 = vmatpush3.bf16.msra.mxu0 %v4166_v30 }
 0x192   :  { %1561 = vmatmul.mubr.bf16.gmra.mrb[108].mxu1 %v4030_v34  ;;  %v4170_v34 = vld [vmem:[%s5668_s4 + $0x8] sm:$0xff]  }
 0x193   :  { %1568 = vmatprep.mubr.bf16.mxu1 %v4031_v35  ;;  %3492 = vmatprep.subr.bf16.mxu0 %v4170_v34  ;;  %v4171_v35 = vld [vmem:[%s5668_s4 + $0x10] sm:$0xff]  }
 0x194   :  { %3493 = vmatpush3.bf16.msra.mxu0 %v4170_v34 }
 0x195   :  { %3494 = vmatprep.subr.bf16.mxu0 %v4171_v35 }
 0x198   :  { %3495 = vmatpush3.bf16.msra.mxu0 %v4171_v35 }
 0x19a   :  { %1569 = vmatmul.mubr.bf16.gmra.mrb[112].mxu1 %v4033_v36  ;;  %v4123_v36 = vld [vmem:[%s5667_s0 + $0x148] ss:$16 sps:$4 sm:$0xff]  }
 0x19b   :  { %1576 = vmatprep.mubr.bf16.mxu1 %v4034_v37  ;;  %v4124_v37 = vld [vmem:[%s5667_s0 + $0x16c] ss:$16 sps:$4 sm:$0xff]  }
 0x1a2   :  { %1577 = vmatmul.mubr.bf16.gmra.mrb[116].mxu1 %v4036_v38  ;;  %v4175_v38 = vld [vmem:[%s5668_s4 + $0x18] sm:$0xff]  }
 0x1a3   :  { %1584 = vmatprep.mubr.bf16.mxu1 %v4037_v39  ;;  %3496 = vmatprep.subr.bf16.mxu0 %v4175_v38  ;;  %v4176_v39 = vld [vmem:[%s5668_s4 + $0x20] sm:$0xff]  }
 0x1a4   :  { %3497 = vmatpush3.bf16.msra.mxu0 %v4175_v38  ;;  %v4188_v38 = vld [vmem:[%s5667_s0 + $0x3a8] ss:$16 sps:$4 sm:$0xff]  }
 0x1a5   :  { %3498 = vmatprep.subr.bf16.mxu0 %v4176_v39 }
 0x1a8   :  { %3499 = vmatpush3.bf16.msra.mxu0 %v4176_v39 }
 0x1aa   :  { %1585 = vmatmul.mubr.bf16.gmra.mrb[120].mxu1 %v4039_v40  ;;  %v4126_v40 = vld [vmem:[%s5667_s0 + $0x168] ss:$16 sps:$4 sm:$0xff]  }
 0x1ab   :  { %1592 = vmatprep.mubr.bf16.mxu1 %v4040_v41  ;;  %v4127_v41 = vld [vmem:[%s5667_s0 + $0x18c] ss:$16 sps:$4 sm:$0xff]  }
 0x1b2   :  { %1593 = vmatmul.mubr.bf16.gmra.mrb[124].mxu1 %v4042_v42  ;;  %v4180_v42 = vld [vmem:[%s5668_s4 + $0x28] sm:$0xff]  }
 0x1b3   :  { %1600 = vmatprep.mubr.bf16.mxu1 %v4043_v43  ;;  %3500 = vmatprep.subr.bf16.mxu0 %v4180_v42  ;;  %v4181_v43 = vld [vmem:[%s5668_s4 + $0x30] sm:$0xff]  }
 0x1b4   :  { %3501 = vmatpush3.bf16.msra.mxu0 %v4180_v42 }
 0x1b5   :  { %3502 = vmatprep.subr.bf16.mxu0 %v4181_v43 }
 0x1b8   :  { %3503 = vmatpush3.bf16.msra.mxu0 %v4181_v43 }
 0x1ba   :  { %1601 = vmatmul.mubr.bf16.gmra.mrb[128].mxu1 %v4045_v44  ;;  %v4129_v44 = vld [vmem:[%s5667_s0 + $0x188] ss:$16 sps:$4 sm:$0xff]  }
 0x1bb   :  { %1608 = vmatprep.mubr.bf16.mxu1 %v4046_v45  ;;  %v4130_v45 = vld [vmem:[%s5667_s0 + $0x1ac] ss:$16 sps:$4 sm:$0xff]  }
 0x1c2   :  { %1609 = vmatmul.mubr.bf16.gmra.mrb[132].mxu1 %v4048_v46  ;;  %v4185_v46 = vld [vmem:[%s5668_s4 + $0x38] sm:$0xff]  }
 0x1c3   :  { %1616 = vmatprep.mubr.bf16.mxu1 %v4049_v47  ;;  %3504 = vmatprep.subr.bf16.mxu0 %v4185_v46  ;;  %v4132_v47 = vld [vmem:[%s5667_s0 + $0x1a8] ss:$16 sps:$4 sm:$0xff]  }
 0x1c4   :  { %3505 = vmatpush3.bf16.msra.mxu0 %v4185_v46 }
 0x1c5   :  { %2506 = vmatprep.subr.bf16.mxu0 %v4323_v32 }
 0x1ca   :  { %1617 = vmatmul.mubr.bf16.gmra.mrb[136].mxu1 %v4051_v48  ;;  %v4133_v48 = vld [vmem:[%s5667_s0 + $0x1cc] ss:$16 sps:$4 sm:$0xff]  }
 0x1cb   :  { %1624 = vmatprep.mubr.bf16.mxu1 %v4052_v49  ;;  %v4135_v49 = vld [vmem:[%s5667_s0 + $0x1c8] ss:$16 sps:$4 sm:$0xff]  }
 0x1d2   :  { %1625 = vmatmul.mubr.bf16.gmra.mrb[140].mxu1 %v4054_v50  ;;  %v4136_v50 = vld [vmem:[%s5667_s0 + $0x1ec] ss:$16 sps:$4 sm:$0xff]  }
 0x1d3   :  { %1632 = vmatprep.mubr.bf16.mxu1 %v4055_v51  ;;  %v4138_v51 = vld [vmem:[%s5667_s0 + $0x1e8] ss:$16 sps:$4 sm:$0xff]  }
 0x1da   :  { %1633 = vmatmul.mubr.bf16.gmra.mrb[144].mxu1 %v4057_v52  ;;  %v4139_v52 = vld [vmem:[%s5667_s0 + $0x20c] ss:$16 sps:$4 sm:$0xff]  }
 0x1db   :  { %1640 = vmatprep.mubr.bf16.mxu1 %v4058_v53  ;;  %v4141_v53 = vld [vmem:[%s5667_s0 + $0x208] ss:$16 sps:$4 sm:$0xff]  }
 0x1e2   :  { %1641 = vmatmul.mubr.bf16.gmra.mrb[148].mxu1 %v4060_v54  ;;  %v4142_v54 = vld [vmem:[%s5667_s0 + $0x22c] ss:$16 sps:$4 sm:$0xff]  }
 0x1e3   :  { %1648 = vmatprep.mubr.bf16.mxu1 %v4061_v55  ;;  %v4144_v55 = vld [vmem:[%s5667_s0 + $0x228] ss:$16 sps:$4 sm:$0xff]  }
 0x1ea   :  { %1649 = vmatmul.mubr.bf16.gmra.mrb[152].mxu1 %v4063_v56  ;;  %v4145_v56 = vld [vmem:[%s5667_s0 + $0x24c] ss:$16 sps:$4 sm:$0xff]  }
 0x1eb   :  { %1656 = vmatprep.mubr.bf16.mxu1 %v4064_v57  ;;  %v4147_v57 = vld [vmem:[%s5667_s0 + $0x248] ss:$16 sps:$4 sm:$0xff]  }
 0x1f2   :  { %1657 = vmatmul.mubr.bf16.gmra.mrb[156].mxu1 %v4066_v58  ;;  %v4148_v58 = vld [vmem:[%s5667_s0 + $0x26c] ss:$16 sps:$4 sm:$0xff]  }
 0x1f3   :  { %1664 = vmatprep.mubr.bf16.mxu1 %v4067_v59  ;;  %v4150_v59 = vld [vmem:[%s5667_s0 + $0x268] ss:$16 sps:$4 sm:$0xff]  }
 0x1fa   :  { %1665 = vmatmul.mubr.bf16.gmra.mrb[160].mxu1 %v4069_v60  ;;  %v4151_v60 = vld [vmem:[%s5667_s0 + $0x28c] ss:$16 sps:$4 sm:$0xff]  }
 0x1fb   :  { %1672 = vmatprep.mubr.bf16.mxu1 %v4070_v61  ;;  %v4153_v61 = vld [vmem:[%s5667_s0 + $0x288] ss:$16 sps:$4 sm:$0xff]  }
 0x202   :  { %1673 = vmatmul.mubr.bf16.gmra.mrb[164].mxu1 %v4072_v62  ;;  %v4154_v62 = vld [vmem:[%s5667_s0 + $0x2ac] ss:$16 sps:$4 sm:$0xff]  }
 0x203   :  { %1680 = vmatprep.mubr.bf16.mxu1 %v4073_v63  ;;  %v4156_v63 = vld [vmem:[%s5667_s0 + $0x2a8] ss:$16 sps:$4 sm:$0xff]  }
 0x20a   :  { %1681 = vmatmul.mubr.bf16.gmra.mrb[168].mxu1 %v4075_v0  ;;  %v4157_v0 = vld [vmem:[%s5667_s0 + $0x2cc] ss:$16 sps:$4 sm:$0xff]  }
 0x20b   :  { %1688 = vmatprep.mubr.bf16.mxu1 %v4076_v1  ;;  %v4159_v1 = vld [vmem:[%s5667_s0 + $0x2c8] ss:$16 sps:$4 sm:$0xff]  }
 0x212   :  { %1689 = vmatmul.mubr.bf16.gmra.mrb[172].mxu1 %v4078_v2  ;;  %v4160_v2 = vld [vmem:[%s5667_s0 + $0x2ec] ss:$16 sps:$4 sm:$0xff]  }
 0x213   :  { %1696 = vmatprep.mubr.bf16.mxu1 %v4079_v3  ;;  %v4162_v3 = vld [vmem:[%s5667_s0 + $0x2e8] ss:$16 sps:$4 sm:$0xff]  }
 0x21a   :  { %1697 = vmatmul.mubr.bf16.gmra.mrb[176].mxu1 %v4081_v4  ;;  %v4163_v4 = vld [vmem:[%s5667_s0 + $0x30c] ss:$16 sps:$4 sm:$0xff]  }
 0x21b   :  { %1704 = vmatprep.mubr.bf16.mxu1 %v4082_v5  ;;  %v4165_v5 = vld [vmem:[%s5667_s0 + $0x308] ss:$16 sps:$4 sm:$0xff]  }
 0x222   :  { %1705 = vmatmul.mubr.bf16.gmra.mrb[180].mxu1 %v4084_v6  ;;  %v4167_v6 = vld [vmem:[%s5667_s0 + $0x32c] ss:$16 sps:$4 sm:$0xff]  }
 0x223   :  { %1712 = vmatprep.mubr.bf16.mxu1 %v4085_v7  ;;  %v4169_v7 = vld [vmem:[%s5667_s0 + $0x328] ss:$16 sps:$4 sm:$0xff]  }
 0x22a   :  { %1713 = vmatmul.mubr.bf16.gmra.mrb[184].mxu1 %v4087_v8  ;;  %v4172_v8 = vld [vmem:[%s5667_s0 + $0x34c] ss:$16 sps:$4 sm:$0xff]  }
 0x22b   :  { %1720 = vmatprep.mubr.bf16.mxu1 %v4088_v9  ;;  %v4174_v9 = vld [vmem:[%s5667_s0 + $0x348] ss:$16 sps:$4 sm:$0xff]  }
 0x232   :  { %1721 = vmatmul.mubr.bf16.gmra.mrb[188].mxu1 %v4090_v10  ;;  %v4177_v10 = vld [vmem:[%s5667_s0 + $0x36c] ss:$16 sps:$4 sm:$0xff]  }
 0x233   :  { %1761 = vmatprep.mubr.bf16.mxu1 %v4093_v11  ;;  %v4896_v11 = vld [vmem:[%s5669_s3] ss:$0 sm:$0xff] }
 0x23a   :  { %1762 = vmatmul.mubr.bf16.vlgmr.msra.gmra.mrb[64].mxu1 %v4091_v12 }
 0x23b   :  { %1769 = vmatprep.mubr.bf16.mxu1 %v4094_v13 }
 0x242   :  { %1770 = vmatmul.mubr.bf16.gmra.mrb[68].mxu1 %v4096_v14 }
 0x243   :  { %1777 = vmatprep.mubr.bf16.mxu1 %v4097_v15  ;;  %v4179_v15 = vld [vmem:[%s5667_s0 + $0x368] ss:$16 sps:$4 sm:$0xff]  }
 0x24a   :  { %1778 = vmatmul.mubr.bf16.gmra.mrb[72].mxu1 %v4099_v16 }
 0x24b   :  { %1785 = vmatprep.mubr.bf16.mxu1 %v4100_v17  ;;  %v4182_v17 = vld [vmem:[%s5667_s0 + $0x38c] ss:$16 sps:$4 sm:$0xff]  }
 0x252   :  { %1786 = vmatmul.mubr.bf16.gmra.mrb[76].mxu1 %v4102_v18 }
 0x253   :  { %1793 = vmatprep.mubr.bf16.mxu1 %v4103_v19 }
 0x25a   :  { %1794 = vmatmul.mubr.bf16.gmra.mrb[80].mxu1 %v4105_v20 }
 0x25b   :  { %1801 = vmatprep.mubr.bf16.mxu1 %v4106_v21 }
 0x262   :  { %1802 = vmatmul.mubr.bf16.gmra.mrb[84].mxu1 %v4108_v22 }
 0x263   :  { %1809 = vmatprep.mubr.bf16.mxu1 %v4109_v23 }
 0x26a   :  { %1810 = vmatmul.mubr.bf16.gmra.mrb[88].mxu1 %v4111_v24 }
 0x26b   :  { %1817 = vmatprep.mubr.bf16.mxu1 %v4112_v25 }
 0x272   :  { %1818 = vmatmul.mubr.bf16.gmra.mrb[92].mxu1 %v4114_v26  ;;  %v4184_v26 = vld [vmem:[%s5667_s0 + $0x388] ss:$16 sps:$4 sm:$0xff]  }
 0x273   :  { %1825 = vmatprep.mubr.bf16.mxu1 %v4115_v27 }
 0x27a   :  { %1826 = vmatmul.mubr.bf16.gmra.mrb[96].mxu1 %v4117_v28  ;;  %v4186_v28 = vld [vmem:[%s5667_s0 + $0x3ac] ss:$16 sps:$4 sm:$0xff]  }
 0x27b   :  { %1833 = vmatprep.mubr.bf16.mxu1 %v4118_v29 }
 0x282   :  { %1834 = vmatmul.mubr.bf16.gmra.mrb[100].mxu1 %v4120_v31 }
 0x283   :  { %1841 = vmatprep.mubr.bf16.mxu1 %v4121_v33 }
 0x28a   :  { %1842 = vmatmul.mubr.bf16.gmra.mrb[104].mxu1 %v4123_v36 }
 0x28b   :  { %1849 = vmatprep.mubr.bf16.mxu1 %v4124_v37 }
 0x292   :  { %1850 = vmatmul.mubr.bf16.gmra.mrb[108].mxu1 %v4126_v40  ;;  %v4189_v40 = vld [vmem:[%s5667_s0 + $0x3cc] ss:$16 sps:$4 sm:$0xff]  }
 0x293   :  { %1857 = vmatprep.mubr.bf16.mxu1 %v4127_v41 }
 0x29a   :  { %1858 = vmatmul.mubr.bf16.gmra.mrb[112].mxu1 %v4129_v44 }
 0x29b   :  { %1865 = vmatprep.mubr.bf16.mxu1 %v4130_v45 }
 0x2a2   :  { %1866 = vmatmul.mubr.bf16.gmra.mrb[116].mxu1 %v4132_v47 }
 0x2a3   :  { %1873 = vmatprep.mubr.bf16.mxu1 %v4133_v48 }
 0x2aa   :  { %1874 = vmatmul.mubr.bf16.gmra.mrb[120].mxu1 %v4135_v49  ;;  %v4191_v49 = vld [vmem:[%s5667_s0 + $0x3c8] ss:$16 sps:$4 sm:$0xff]  }
 0x2ab   :  { %1881 = vmatprep.mubr.bf16.mxu1 %v4136_v50 }
 0x2b2   :  { %1882 = vmatmul.mubr.bf16.gmra.mrb[124].mxu1 %v4138_v51  ;;  %v4192_v51 = vld [vmem:[%s5667_s0 + $0x3ec] ss:$16 sps:$4 sm:$0xff]  }
 0x2b3   :  { %1889 = vmatprep.mubr.bf16.mxu1 %v4139_v52 }
 0x2ba   :  { %1890 = vmatmul.mubr.bf16.gmra.mrb[128].mxu1 %v4141_v53 }
 0x2bb   :  { %1897 = vmatprep.mubr.bf16.mxu1 %v4142_v54 }
 0x2c2   :  { %1898 = vmatmul.mubr.bf16.gmra.mrb[132].mxu1 %v4144_v55 }
 0x2c3   :  { %1905 = vmatprep.mubr.bf16.mxu1 %v4145_v56 }
 0x2ca   :  { %1906 = vmatmul.mubr.bf16.gmra.mrb[136].mxu1 %v4147_v57 }
 0x2cb   :  { %1913 = vmatprep.mubr.bf16.mxu1 %v4148_v58 }
 0x2d2   :  { %1914 = vmatmul.mubr.bf16.gmra.mrb[140].mxu1 %v4150_v59 }
 0x2d3   :  { %1921 = vmatprep.mubr.bf16.mxu1 %v4151_v60  ;;  %v4194_v60 = vld [vmem:[%s5667_s0 + $0x3e8] ss:$16 sps:$4 sm:$0xff]  }
 0x2da   :  { %1922 = vmatmul.mubr.bf16.gmra.mrb[144].mxu1 %v4153_v61 }
 0x2db   :  { %1929 = vmatprep.mubr.bf16.mxu1 %v4154_v62 }
 0x2e2   :  { %1930 = vmatmul.mubr.bf16.gmra.mrb[148].mxu1 %v4156_v63 }
 0x2e3   :  { %1937 = vmatprep.mubr.bf16.mxu1 %v4157_v0 }
 0x2ea   :  { %1938 = vmatmul.mubr.bf16.gmra.mrb[152].mxu1 %v4159_v1 }
 0x2eb   :  { %1945 = vmatprep.mubr.bf16.mxu1 %v4160_v2 }
 0x2f2   :  { %1946 = vmatmul.mubr.bf16.gmra.mrb[156].mxu1 %v4162_v3 }
 0x2f3   :  { %1953 = vmatprep.mubr.bf16.mxu1 %v4163_v4 }
 0x2fa   :  { %1954 = vmatmul.mubr.bf16.gmra.mrb[160].mxu1 %v4165_v5 }
 0x2fb   :  { %1961 = vmatprep.mubr.bf16.mxu1 %v4167_v6 }
 0x302   :  { %1962 = vmatmul.mubr.bf16.gmra.mrb[164].mxu1 %v4169_v7 }
 0x303   :  { %1969 = vmatprep.mubr.bf16.mxu1 %v4172_v8 }
 0x30a   :  { %1970 = vmatmul.mubr.bf16.gmra.mrb[168].mxu1 %v4174_v9 }
 0x30b   :  { %1977 = vmatprep.mubr.bf16.mxu1 %v4177_v10 }
 0x30d   :  { %v1763_v12 = vpop.f32.mrb[64].mxu1 }
 0x30e   :  { %v3570_v13 = vadd.f32 %v4896_v11, %v1763_v12  ;;  %v1765_v14 = vpop.f32.mrb[65].mxu1 }
 0x30f   :  { %v1766_v16 = vpop.f32.mrb[66].mxu1 }
 0x310   :  { %v3571_v18 = vadd.f32 %v4896_v11, %v1766_v16  ;;  %v1768_v19 = vpop.f32.mrb[67].mxu1  ;;  %v2018_v20 = vmax.f32 %v3570_v13, 0.0 }
 0x312   :  { %v2019_v21 = vmax.f32 %v3571_v18, 0.0  ;;  %1978 = vmatmul.mubr.bf16.gmra.mrb[172].mxu1 %v4179_v15 }
 0x313   :  { %1985 = vmatprep.mubr.bf16.mxu1 %v4182_v17 }
 0x314   :  { %v2082_v22 = vpack.c.bf16 %v2019_v21, %v2018_v20 }
 0x315   :  { %v1771_v23 = vpop.f32.mrb[68].mxu1 }
 0x316   :  { %v3572_v24 = vadd.f32 %v4896_v11, %v1771_v23  ;;  %v1773_v25 = vpop.f32.mrb[69].mxu1  ;;  %3506 = vmatprep.mubr.bf16.mxu0 %v2082_v22 }
 0x317   :  { %v1774_v27 = vpop.f32.mrb[70].mxu1 }
 0x318   :  { %v3573_v29 = vadd.f32 %v4896_v11, %v1774_v27  ;;  %v1776_v30 = vpop.f32.mrb[71].mxu1  ;;  %v2020_v31 = vmax.f32 %v3572_v24, 0.0 }
 0x31a   :  { %v2021_v33 = vmax.f32 %v3573_v29, 0.0  ;;  %1986 = vmatmul.mubr.bf16.gmra.mrb[176].mxu1 %v4184_v26 }
 0x31b   :  { %1993 = vmatprep.mubr.bf16.mxu1 %v4186_v28 }
 0x31c   :  { %v2083_v34 = vpack.c.bf16 %v2021_v33, %v2020_v31 }
 0x31d   :  { %v1779_v35 = vpop.f32.mrb[72].mxu1 }
 0x31e   :  { %v3574_v36 = vadd.f32 %v4896_v11, %v1779_v35  ;;  %v1781_v37 = vpop.f32.mrb[73].mxu1  ;;  %3507 = vmatmul.mubr.bf16.vlgmr.msra.gmra.mrb[0].mxu0 %v2083_v34 }
 0x31f   :  { %v1782_v39 = vpop.f32.mrb[74].mxu1 }
 0x320   :  { %v3575_v41 = vadd.f32 %v4896_v11, %v1782_v39  ;;  %v1784_v42 = vpop.f32.mrb[75].mxu1  ;;  %v2022_v43 = vmax.f32 %v3574_v36, 0.0 }
 0x322   :  { %v2023_v44 = vmax.f32 %v3575_v41, 0.0  ;;  %1994 = vmatmul.mubr.bf16.gmra.mrb[180].mxu1 %v4188_v38 }
 0x323   :  { %2001 = vmatprep.mubr.bf16.mxu1 %v4189_v40 }
 0x324   :  { %v2084_v45 = vpack.c.bf16 %v2023_v44, %v2022_v43 }
 0x325   :  { %v1787_v46 = vpop.f32.mrb[76].mxu1 }
 0x326   :  { %v3576_v47 = vadd.f32 %v4896_v11, %v1787_v46  ;;  %v1789_v48 = vpop.f32.mrb[77].mxu1  ;;  %3510 = vmatprep.mubr.bf16.mxu0 %v2084_v45 }
 0x327   :  { %v1790_v50 = vpop.f32.mrb[78].mxu1 }
 0x328   :  { %v3577_v52 = vadd.f32 %v4896_v11, %v1790_v50  ;;  %v1792_v53 = vpop.f32.mrb[79].mxu1  ;;  %v2024_v54 = vmax.f32 %v3576_v47, 0.0 }
 0x32a   :  { %v2025_v55 = vmax.f32 %v3577_v52, 0.0  ;;  %2002 = vmatmul.mubr.bf16.gmra.mrb[184].mxu1 %v4191_v49 }
 0x32b   :  { %2009 = vmatprep.mubr.bf16.mxu1 %v4192_v51 }
 0x32c   :  { %v2085_v56 = vpack.c.bf16 %v2025_v55, %v2024_v54 }
 0x32d   :  { %v1795_v57 = vpop.f32.mrb[80].mxu1 }
 0x32e   :  { %v3578_v58 = vadd.f32 %v4896_v11, %v1795_v57  ;;  %v1797_v59 = vpop.f32.mrb[81].mxu1  ;;  %3511 = vmatmul.mubr.bf16.gmra.mrb[4].mxu0 %v2085_v56 }
 0x32f   :  { %v1798_v61 = vpop.f32.mrb[82].mxu1 }
 0x330   :  { %v3579_v62 = vadd.f32 %v4896_v11, %v1798_v61  ;;  %v1800_v63 = vpop.f32.mrb[83].mxu1  ;;  %v2026_v0 = vmax.f32 %v3578_v58, 0.0 }
 0x332   :  { %v2027_v1 = vmax.f32 %v3579_v62, 0.0  ;;  %2010 = vmatmul.mubr.bf16.gmra.mrb[188].mxu1 %v4194_v60 }
 0x334   :  { %v2086_v2 = vpack.c.bf16 %v2027_v1, %v2026_v0 }
 0x335   :  { %v1803_v3 = vpop.f32.mrb[84].mxu1 }
 0x336   :  { %v3580_v4 = vadd.f32 %v4896_v11, %v1803_v3  ;;  %v1805_v5 = vpop.f32.mrb[85].mxu1  ;;  %3514 = vmatprep.mubr.bf16.mxu0 %v2086_v2 }
 0x337   :  { %v1806_v6 = vpop.f32.mrb[86].mxu1 }
 0x338   :  { %v3581_v7 = vadd.f32 %v4896_v11, %v1806_v6  ;;  %v1808_v8 = vpop.f32.mrb[87].mxu1  ;;  %v2028_v9 = vmax.f32 %v3580_v4, 0.0 }
 0x33a   :  { %v2029_v10 = vmax.f32 %v3581_v7, 0.0 }
 0x33c   :  { %v2087_v12 = vpack.c.bf16 %v2029_v10, %v2028_v9 }
 0x33d   :  { %v1811_v13 = vpop.f32.mrb[88].mxu1 }
 0x33e   :  { %v3582_v14 = vadd.f32 %v4896_v11, %v1811_v13  ;;  %v1813_v15 = vpop.f32.mrb[89].mxu1  ;;  %3515 = vmatmul.mubr.bf16.gmra.mrb[8].mxu0 %v2087_v12 }
 0x33f   :  { %v1814_v16 = vpop.f32.mrb[90].mxu1 }
 0x340   :  { %v3583_v17 = vadd.f32 %v4896_v11, %v1814_v16  ;;  %v1816_v18 = vpop.f32.mrb[91].mxu1  ;;  %v2030_v19 = vmax.f32 %v3582_v14, 0.0 }
 0x342   :  { %v2031_v20 = vmax.f32 %v3583_v17, 0.0 }
 0x344   :  { %v2088_v21 = vpack.c.bf16 %v2031_v20, %v2030_v19 }
 0x345   :  { %v1819_v22 = vpop.f32.mrb[92].mxu1 }
 0x346   :  { %v3584_v23 = vadd.f32 %v4896_v11, %v1819_v22  ;;  %v1821_v24 = vpop.f32.mrb[93].mxu1  ;;  %3518 = vmatprep.mubr.bf16.mxu0 %v2088_v21 }
 0x347   :  { %v1822_v25 = vpop.f32.mrb[94].mxu1 }
 0x348   :  { %v3585_v26 = vadd.f32 %v4896_v11, %v1822_v25  ;;  %v1824_v27 = vpop.f32.mrb[95].mxu1  ;;  %v2032_v28 = vmax.f32 %v3584_v23, 0.0 }
 0x34a   :  { %v2033_v29 = vmax.f32 %v3585_v26, 0.0 }
 0x34c   :  { %v2089_v30 = vpack.c.bf16 %v2033_v29, %v2032_v28 }
 0x34d   :  { %v1827_v31 = vpop.f32.mrb[96].mxu1 }
 0x34e   :  { %v3586_v33 = vadd.f32 %v4896_v11, %v1827_v31  ;;  %v1829_v34 = vpop.f32.mrb[97].mxu1  ;;  %3519 = vmatmul.mubr.bf16.gmra.mrb[12].mxu0 %v2089_v30 }
 0x34f   :  { %v1830_v35 = vpop.f32.mrb[98].mxu1 }
 0x350   :  { %v3587_v36 = vadd.f32 %v4896_v11, %v1830_v35  ;;  %v1832_v37 = vpop.f32.mrb[99].mxu1  ;;  %v2034_v38 = vmax.f32 %v3586_v33, 0.0 }
 0x352   :  { %v2035_v39 = vmax.f32 %v3587_v36, 0.0 }
 0x354   :  { %v2090_v40 = vpack.c.bf16 %v2035_v39, %v2034_v38 }
 0x355   :  { %v1835_v41 = vpop.f32.mrb[100].mxu1 }
 0x356   :  { %v3588_v42 = vadd.f32 %v4896_v11, %v1835_v41  ;;  %v1837_v43 = vpop.f32.mrb[101].mxu1  ;;  %3522 = vmatprep.mubr.bf16.mxu0 %v2090_v40 }
 0x357   :  { %v1838_v44 = vpop.f32.mrb[102].mxu1 }
 0x358   :  { %v3589_v45 = vadd.f32 %v4896_v11, %v1838_v44  ;;  %v1840_v46 = vpop.f32.mrb[103].mxu1  ;;  %v2036_v47 = vmax.f32 %v3588_v42, 0.0 }
 0x35a   :  { %v2037_v48 = vmax.f32 %v3589_v45, 0.0 }
 0x35c   :  { %v2091_v49 = vpack.c.bf16 %v2037_v48, %v2036_v47 }
 0x35d   :  { %v1843_v50 = vpop.f32.mrb[104].mxu1 }
 0x35e   :  { %v3590_v51 = vadd.f32 %v4896_v11, %v1843_v50  ;;  %v1845_v52 = vpop.f32.mrb[105].mxu1  ;;  %3523 = vmatmul.mubr.bf16.gmra.mrb[16].mxu0 %v2091_v49 }
 0x35f   :  { %v1846_v53 = vpop.f32.mrb[106].mxu1 }
 0x360   :  { %v3591_v54 = vadd.f32 %v4896_v11, %v1846_v53  ;;  %v1848_v55 = vpop.f32.mrb[107].mxu1  ;;  %v2038_v56 = vmax.f32 %v3590_v51, 0.0 }
 0x362   :  { %v2039_v57 = vmax.f32 %v3591_v54, 0.0 }
 0x364   :  { %v2092_v58 = vpack.c.bf16 %v2039_v57, %v2038_v56 }
 0x365   :  { %v1851_v59 = vpop.f32.mrb[108].mxu1 }
 0x366   :  { %v3592_v60 = vadd.f32 %v4896_v11, %v1851_v59  ;;  %v1853_v61 = vpop.f32.mrb[109].mxu1  ;;  %3526 = vmatprep.mubr.bf16.mxu0 %v2092_v58 }
 0x367   :  { %v1854_v62 = vpop.f32.mrb[110].mxu1 }
 0x368   :  { %v3593_v63 = vadd.f32 %v4896_v11, %v1854_v62  ;;  %v1856_v0 = vpop.f32.mrb[111].mxu1  ;;  %v2040_v1 = vmax.f32 %v3592_v60, 0.0 }
 0x36a   :  { %v2041_v2 = vmax.f32 %v3593_v63, 0.0 }
 0x36c   :  { %v2093_v3 = vpack.c.bf16 %v2041_v2, %v2040_v1 }
 0x36d   :  { %v1859_v4 = vpop.f32.mrb[112].mxu1 }
 0x36e   :  { %v3594_v5 = vadd.f32 %v4896_v11, %v1859_v4  ;;  %v1861_v6 = vpop.f32.mrb[113].mxu1  ;;  %3527 = vmatmul.mubr.bf16.gmra.mrb[20].mxu0 %v2093_v3 }
 0x36f   :  { %v1862_v7 = vpop.f32.mrb[114].mxu1 }
 0x370   :  { %v3595_v8 = vadd.f32 %v4896_v11, %v1862_v7  ;;  %v1864_v9 = vpop.f32.mrb[115].mxu1  ;;  %v2042_v10 = vmax.f32 %v3594_v5, 0.0 }
 0x372   :  { %v2043_v12 = vmax.f32 %v3595_v8, 0.0 }
 0x374   :  { %v2094_v13 = vpack.c.bf16 %v2043_v12, %v2042_v10 }
 0x375   :  { %v1867_v14 = vpop.f32.mrb[116].mxu1 }
 0x376   :  { %v3596_v15 = vadd.f32 %v4896_v11, %v1867_v14  ;;  %v1869_v16 = vpop.f32.mrb[117].mxu1  ;;  %3530 = vmatprep.mubr.bf16.mxu0 %v2094_v13 }
 0x377   :  { %v1870_v17 = vpop.f32.mrb[118].mxu1 }
 0x378   :  { %v3597_v18 = vadd.f32 %v4896_v11, %v1870_v17  ;;  %v1872_v19 = vpop.f32.mrb[119].mxu1  ;;  %v2044_v20 = vmax.f32 %v3596_v15, 0.0 }
 0x37a   :  { %v2045_v21 = vmax.f32 %v3597_v18, 0.0 }
 0x37c   :  { %v2095_v22 = vpack.c.bf16 %v2045_v21, %v2044_v20 }
 0x37d   :  { %v1875_v23 = vpop.f32.mrb[120].mxu1 }
 0x37e   :  { %v3598_v24 = vadd.f32 %v4896_v11, %v1875_v23  ;;  %v1877_v25 = vpop.f32.mrb[121].mxu1  ;;  %3531 = vmatmul.mubr.bf16.gmra.mrb[24].mxu0 %v2095_v22 }
 0x37f   :  { %v1878_v26 = vpop.f32.mrb[122].mxu1 }
 0x380   :  { %v3599_v27 = vadd.f32 %v4896_v11, %v1878_v26  ;;  %v1880_v28 = vpop.f32.mrb[123].mxu1  ;;  %v2046_v29 = vmax.f32 %v3598_v24, 0.0 }
 0x382   :  { %v2047_v30 = vmax.f32 %v3599_v27, 0.0 }
 0x384   :  { %v2096_v31 = vpack.c.bf16 %v2047_v30, %v2046_v29 }
 0x385   :  { %v1883_v33 = vpop.f32.mrb[124].mxu1 }
 0x386   :  { %v3600_v34 = vadd.f32 %v4896_v11, %v1883_v33  ;;  %v1885_v35 = vpop.f32.mrb[125].mxu1  ;;  %3534 = vmatprep.mubr.bf16.mxu0 %v2096_v31 }
 0x387   :  { %v1886_v36 = vpop.f32.mrb[126].mxu1 }
 0x388   :  { %v3601_v37 = vadd.f32 %v4896_v11, %v1886_v36  ;;  %v1888_v38 = vpop.f32.mrb[127].mxu1  ;;  %v2048_v39 = vmax.f32 %v3600_v34, 0.0 }
 0x38a   :  { %v2049_v40 = vmax.f32 %v3601_v37, 0.0 }
 0x38c   :  { %v2097_v41 = vpack.c.bf16 %v2049_v40, %v2048_v39 }
 0x38d   :  { %v1891_v42 = vpop.f32.mrb[128].mxu1 }
 0x38e   :  { %v3602_v43 = vadd.f32 %v4896_v11, %v1891_v42  ;;  %v1893_v44 = vpop.f32.mrb[129].mxu1  ;;  %3535 = vmatmul.mubr.bf16.gmra.mrb[28].mxu0 %v2097_v41 }
 0x38f   :  { %v1894_v45 = vpop.f32.mrb[130].mxu1 }
 0x390   :  { %v3603_v46 = vadd.f32 %v4896_v11, %v1894_v45  ;;  %v1896_v47 = vpop.f32.mrb[131].mxu1  ;;  %v2050_v48 = vmax.f32 %v3602_v43, 0.0 }
 0x392   :  { %v2051_v49 = vmax.f32 %v3603_v46, 0.0 }
 0x394   :  { %v2098_v50 = vpack.c.bf16 %v2051_v49, %v2050_v48 }
 0x395   :  { %v1899_v51 = vpop.f32.mrb[132].mxu1 }
 0x396   :  { %v3604_v52 = vadd.f32 %v4896_v11, %v1899_v51  ;;  %v1901_v53 = vpop.f32.mrb[133].mxu1  ;;  %3538 = vmatprep.mubr.bf16.mxu0 %v2098_v50 }
 0x397   :  { %v1902_v54 = vpop.f32.mrb[134].mxu1 }
 0x398   :  { %v3605_v55 = vadd.f32 %v4896_v11, %v1902_v54  ;;  %v1904_v56 = vpop.f32.mrb[135].mxu1  ;;  %v2052_v57 = vmax.f32 %v3604_v52, 0.0 }
 0x39a   :  { %v2053_v58 = vmax.f32 %v3605_v55, 0.0 }
 0x39c   :  { %v2099_v59 = vpack.c.bf16 %v2053_v58, %v2052_v57 }
 0x39d   :  { %v1907_v60 = vpop.f32.mrb[136].mxu1 }
 0x39e   :  { %v3606_v61 = vadd.f32 %v4896_v11, %v1907_v60  ;;  %v1909_v62 = vpop.f32.mrb[137].mxu1  ;;  %3539 = vmatmul.mubr.bf16.gmra.mrb[32].mxu0 %v2099_v59 }
 0x39f   :  { %v1910_v63 = vpop.f32.mrb[138].mxu1 }
 0x3a0   :  { %v3607_v0 = vadd.f32 %v4896_v11, %v1910_v63  ;;  %v1912_v1 = vpop.f32.mrb[139].mxu1  ;;  %v2054_v2 = vmax.f32 %v3606_v61, 0.0 }
 0x3a2   :  { %v2055_v3 = vmax.f32 %v3607_v0, 0.0 }
 0x3a4   :  { %v2100_v4 = vpack.c.bf16 %v2055_v3, %v2054_v2 }
 0x3a5   :  { %v1915_v5 = vpop.f32.mrb[140].mxu1 }
 0x3a6   :  { %v3608_v6 = vadd.f32 %v4896_v11, %v1915_v5  ;;  %v1917_v7 = vpop.f32.mrb[141].mxu1  ;;  %3542 = vmatprep.mubr.bf16.mxu0 %v2100_v4 }
 0x3a7   :  { %v1918_v8 = vpop.f32.mrb[142].mxu1 }
 0x3a8   :  { %v3609_v9 = vadd.f32 %v4896_v11, %v1918_v8  ;;  %v1920_v10 = vpop.f32.mrb[143].mxu1  ;;  %v2056_v12 = vmax.f32 %v3608_v6, 0.0 }
 0x3aa   :  { %v2057_v13 = vmax.f32 %v3609_v9, 0.0 }
 0x3ac   :  { %v2101_v14 = vpack.c.bf16 %v2057_v13, %v2056_v12 }
 0x3ad   :  { %v1923_v15 = vpop.f32.mrb[144].mxu1 }
 0x3ae   :  { %v3610_v16 = vadd.f32 %v4896_v11, %v1923_v15  ;;  %v1925_v17 = vpop.f32.mrb[145].mxu1  ;;  %3543 = vmatmul.mubr.bf16.gmra.mrb[36].mxu0 %v2101_v14 }
 0x3af   :  { %v1926_v18 = vpop.f32.mrb[146].mxu1 }
 0x3b0   :  { %v3611_v19 = vadd.f32 %v4896_v11, %v1926_v18  ;;  %v1928_v20 = vpop.f32.mrb[147].mxu1  ;;  %v2058_v21 = vmax.f32 %v3610_v16, 0.0 }
 0x3b2   :  { %v2059_v22 = vmax.f32 %v3611_v19, 0.0 }
 0x3b4   :  { %v2102_v23 = vpack.c.bf16 %v2059_v22, %v2058_v21 }
 0x3b5   :  { %v1931_v24 = vpop.f32.mrb[148].mxu1 }
 0x3b6   :  { %v3612_v25 = vadd.f32 %v4896_v11, %v1931_v24  ;;  %v1933_v26 = vpop.f32.mrb[149].mxu1  ;;  %3546 = vmatprep.mubr.bf16.mxu0 %v2102_v23 }
 0x3b7   :  { %v1934_v27 = vpop.f32.mrb[150].mxu1 }
 0x3b8   :  { %v3613_v28 = vadd.f32 %v4896_v11, %v1934_v27  ;;  %v1936_v29 = vpop.f32.mrb[151].mxu1  ;;  %v2060_v30 = vmax.f32 %v3612_v25, 0.0 }
 0x3ba   :  { %v2061_v31 = vmax.f32 %v3613_v28, 0.0 }
 0x3bc   :  { %v2103_v33 = vpack.c.bf16 %v2061_v31, %v2060_v30 }
 0x3bd   :  { %v1939_v34 = vpop.f32.mrb[152].mxu1 }
 0x3be   :  { %v3614_v35 = vadd.f32 %v4896_v11, %v1939_v34  ;;  %v1941_v36 = vpop.f32.mrb[153].mxu1  ;;  %3547 = vmatmul.mubr.bf16.gmra.mrb[40].mxu0 %v2103_v33 }
 0x3bf   :  { %v1942_v37 = vpop.f32.mrb[154].mxu1 }
 0x3c0   :  { %v3615_v38 = vadd.f32 %v4896_v11, %v1942_v37  ;;  %v1944_v39 = vpop.f32.mrb[155].mxu1  ;;  %v2062_v40 = vmax.f32 %v3614_v35, 0.0 }
 0x3c2   :  { %v2063_v41 = vmax.f32 %v3615_v38, 0.0 }
 0x3c4   :  { %v2104_v42 = vpack.c.bf16 %v2063_v41, %v2062_v40 }
 0x3c5   :  { %v1947_v43 = vpop.f32.mrb[156].mxu1 }
 0x3c6   :  { %v3616_v44 = vadd.f32 %v4896_v11, %v1947_v43  ;;  %v1949_v45 = vpop.f32.mrb[157].mxu1  ;;  %3550 = vmatprep.mubr.bf16.mxu0 %v2104_v42 }
 0x3c7   :  { %v1950_v46 = vpop.f32.mrb[158].mxu1 }
 0x3c8   :  { %v3617_v47 = vadd.f32 %v4896_v11, %v1950_v46  ;;  %v1952_v48 = vpop.f32.mrb[159].mxu1  ;;  %v2064_v49 = vmax.f32 %v3616_v44, 0.0 }
 0x3ca   :  { %v2065_v50 = vmax.f32 %v3617_v47, 0.0 }
 0x3cc   :  { %v2105_v51 = vpack.c.bf16 %v2065_v50, %v2064_v49 }
 0x3cd   :  { %v1955_v52 = vpop.f32.mrb[160].mxu1 }
 0x3ce   :  { %v3618_v53 = vadd.f32 %v4896_v11, %v1955_v52  ;;  %v1957_v54 = vpop.f32.mrb[161].mxu1  ;;  %3551 = vmatmul.mubr.bf16.gmra.mrb[44].mxu0 %v2105_v51 }
 0x3cf   :  { %v1958_v55 = vpop.f32.mrb[162].mxu1 }
 0x3d0   :  { %v3619_v56 = vadd.f32 %v4896_v11, %v1958_v55  ;;  %v1960_v57 = vpop.f32.mrb[163].mxu1  ;;  %v2066_v58 = vmax.f32 %v3618_v53, 0.0 }
 0x3d2   :  { %v2067_v59 = vmax.f32 %v3619_v56, 0.0 }
 0x3d4   :  { %v2106_v60 = vpack.c.bf16 %v2067_v59, %v2066_v58 }
 0x3d5   :  { %v1963_v61 = vpop.f32.mrb[164].mxu1 }
 0x3d6   :  { %v3620_v62 = vadd.f32 %v4896_v11, %v1963_v61  ;;  %v1965_v63 = vpop.f32.mrb[165].mxu1  ;;  %3554 = vmatprep.mubr.bf16.mxu0 %v2106_v60 }
 0x3d7   :  { %v1966_v0 = vpop.f32.mrb[166].mxu1 }
 0x3d8   :  { %v3621_v1 = vadd.f32 %v4896_v11, %v1966_v0  ;;  %v1968_v2 = vpop.f32.mrb[167].mxu1  ;;  %v2068_v3 = vmax.f32 %v3620_v62, 0.0 }
 0x3da   :  { %v2069_v4 = vmax.f32 %v3621_v1, 0.0 }
 0x3dc   :  { %v2107_v5 = vpack.c.bf16 %v2069_v4, %v2068_v3 }
 0x3dd   :  { %v1971_v6 = vpop.f32.mrb[168].mxu1 }
 0x3de   :  { %v3622_v7 = vadd.f32 %v4896_v11, %v1971_v6  ;;  %v1973_v8 = vpop.f32.mrb[169].mxu1  ;;  %3555 = vmatmul.mubr.bf16.gmra.mrb[48].mxu0 %v2107_v5 }
 0x3df   :  { %v1974_v9 = vpop.f32.mrb[170].mxu1 }
 0x3e0   :  { %v3623_v10 = vadd.f32 %v4896_v11, %v1974_v9  ;;  %v1976_v12 = vpop.f32.mrb[171].mxu1  ;;  %v2070_v13 = vmax.f32 %v3622_v7, 0.0 }
 0x3e2   :  { %v2071_v14 = vmax.f32 %v3623_v10, 0.0  ;;  %v4195_v10 = vld [vmem:[%s5667_s0 + $0x4] ss:$16 sps:$4 sm:$0xff]  }
 0x3e4   :  { %v2108_v15 = vpack.c.bf16 %v2071_v14, %v2070_v13 }
 0x3e5   :  { %v1979_v16 = vpop.f32.mrb[172].mxu1 }
 0x3e6   :  { %v3624_v17 = vadd.f32 %v4896_v11, %v1979_v16  ;;  %v1981_v18 = vpop.f32.mrb[173].mxu1  ;;  %3558 = vmatprep.mubr.bf16.mxu0 %v2108_v15 }
 0x3e7   :  { %v1982_v19 = vpop.f32.mrb[174].mxu1 }
 0x3e8   :  { %v3625_v20 = vadd.f32 %v4896_v11, %v1982_v19  ;;  %v1984_v21 = vpop.f32.mrb[175].mxu1  ;;  %v2072_v22 = vmax.f32 %v3624_v17, 0.0 }
 0x3ea   :  { %v2073_v23 = vmax.f32 %v3625_v20, 0.0 }
 0x3ec   :  { %v2109_v24 = vpack.c.bf16 %v2073_v23, %v2072_v22 }
 0x3ed   :  { %v1987_v25 = vpop.f32.mrb[176].mxu1 }
 0x3ee   :  { %v3626_v26 = vadd.f32 %v4896_v11, %v1987_v25  ;;  %v1989_v27 = vpop.f32.mrb[177].mxu1  ;;  %3559 = vmatmul.mubr.bf16.gmra.mrb[52].mxu0 %v2109_v24 }
 0x3ef   :  { %v1990_v28 = vpop.f32.mrb[178].mxu1 }
 0x3f0   :  { %v3627_v29 = vadd.f32 %v4896_v11, %v1990_v28  ;;  %v1992_v30 = vpop.f32.mrb[179].mxu1  ;;  %v2074_v33 = vmax.f32 %v3626_v26, 0.0 }
 0x3f1   :  { %v3508_v31 = vpop.f32.mrb[0].mxu0 }
 0x3f2   :  { %v2075_v34 = vmax.f32 %v3627_v29, 0.0  ;;  %v2212_v35 = vpop.f32.mrb[1].mxu0 }
 0x3f3   :  { %v3509_v36 = vpop.f32.mrb[2].mxu0 }
 0x3f4   :  { %v2110_v37 = vpack.c.bf16 %v2075_v34, %v2074_v33  ;;  %v2468_v38 = vpack.c.bf16 %v3509_v36, %v3508_v31  ;;  %v2215_v39 = vpop.f32.mrb[3].mxu0 }
 0x3f5   :  { %v2467_v40 = vpack.c.bf16 %v2215_v39, %v2212_v35  ;;  %v1995_v41 = vpop.f32.mrb[180].mxu1 }
 0x3f6   :  { %v3628_v42 = vadd.f32 %v4896_v11, %v1995_v41  ;;  %v1997_v43 = vpop.f32.mrb[181].mxu1  ;;  %3562 = vmatprep.mubr.bf16.mxu0 %v2110_v37 }
 0x3f7   :  { %v1998_v44 = vpop.f32.mrb[182].mxu1  ;;  %2507 = vmatpush1.bf16.msra.mxu0 %v2467_v40 }
 0x3f8   :  { %v3629_v45 = vadd.f32 %v4896_v11, %v1998_v44  ;;  %v2000_v46 = vpop.f32.mrb[183].mxu1  ;;  %2508 = vmatprep.subr.bf16.mxu0 %v4323_v32  ;;  %v2076_v47 = vmax.f32 %v3628_v42, 0.0 }
 0x3fa   :  { %v2077_v48 = vmax.f32 %v3629_v45, 0.0 }
 0x3fb   :  { %2509 = vmatpush1.bf16.msra.mxu0 %v2468_v38 }
 0x3fc   :  { %v2111_v49 = vpack.c.bf16 %v2077_v48, %v2076_v47  ;;  %2510 = vmatprep.subr.bf16.mxu0 %v4323_v32  ;;  %v4196_v48 = vld [vmem:[%s5667_s0] ss:$16 sps:$4 sm:$0xff]  }
 0x3fd   :  { %v2003_v50 = vpop.f32.mrb[184].mxu1 }
 0x3fe   :  { %v3630_v51 = vadd.f32 %v4896_v11, %v2003_v50  ;;  %v2005_v52 = vpop.f32.mrb[185].mxu1  ;;  %3563 = vmatmul.mubr.bf16.gmra.mrb[56].mxu0 %v2111_v49  ;;  %v4197_v49 = vld [vmem:[%s5667_s0 + $0x24] ss:$16 sps:$4 sm:$0xff]  }
 0x3ff   :  { %v2006_v53 = vpop.f32.mrb[186].mxu1 }
 0x400   :  { %v3631_v54 = vadd.f32 %v4896_v11, %v2006_v53  ;;  %v2008_v55 = vpop.f32.mrb[187].mxu1  ;;  %v2078_v57 = vmax.f32 %v3630_v51, 0.0 }
 0x401   :  { %v3512_v56 = vpop.f32.mrb[4].mxu0 }
 0x402   :  { %v2079_v58 = vmax.f32 %v3631_v54, 0.0  ;;  %v2228_v59 = vpop.f32.mrb[5].mxu0 }
 0x403   :  { %v3513_v60 = vpop.f32.mrb[6].mxu0 }
 0x404   :  { %v2112_v61 = vpack.c.bf16 %v2079_v58, %v2078_v57  ;;  %v2470_v62 = vpack.c.bf16 %v3513_v60, %v3512_v56  ;;  %v2231_v63 = vpop.f32.mrb[7].mxu0  ;;  %v4198_v56 = vld [vmem:[%s5667_s0 + $0x20] ss:$16 sps:$4 sm:$0xff]   ;;  %v4199_v57 = vld [vmem:[%s5667_s0 + $0x44] ss:$16 sps:$4 sm:$0xff]  }
 0x405   :  { %v2469_v0 = vpack.c.bf16 %v2231_v63, %v2228_v59  ;;  %v2011_v1 = vpop.f32.mrb[188].mxu1  ;;  %v4200_v58 = vld [vmem:[%s5667_s0 + $0x40] ss:$16 sps:$4 sm:$0xff]   ;;  %v4201_v59 = vld [vmem:[%s5667_s0 + $0x64] ss:$16 sps:$4 sm:$0xff]  }
 0x406   :  { %v3632_v2 = vadd.f32 %v4896_v11, %v2011_v1  ;;  %v2013_v3 = vpop.f32.mrb[189].mxu1  ;;  %3566 = vmatprep.mubr.bf16.mxu0 %v2112_v61 }
 0x407   :  { %v2014_v4 = vpop.f32.mrb[190].mxu1  ;;  %2511 = vmatpush1.bf16.msra.mxu0 %v2469_v0  ;;  %v4203_v3 = vld [vmem:[%s5667_s0 + $0x84] ss:$16 sps:$4 sm:$0xff]  }
 0x408   :  { %v3633_v5 = vadd.f32 %v4896_v11, %v2014_v4  ;;  %v2016_v6 = vpop.f32.mrb[191].mxu1  ;;  %2512 = vmatprep.subr.bf16.mxu0 %v4323_v32  ;;  %v2080_v7 = vmax.f32 %v3632_v2, 0.0  ;;  %v4202_v2 = vld [vmem:[%s5667_s0 + $0x60] ss:$16 sps:$4 sm:$0xff]  }
 0x409   :  { %v4204_v4 = vld [vmem:[%s5667_s0 + $0x80] ss:$16 sps:$4 sm:$0xff]  }
 0x40a   :  { %v2081_v8 = vmax.f32 %v3633_v5, 0.0  ;;  %v4205_v5 = vld [vmem:[%s5667_s0 + $0xa4] ss:$16 sps:$4 sm:$0xff]  }
 0x40b   :  { %2513 = vmatpush1.bf16.msra.mxu0 %v2470_v62 }
 0x40c   :  { %v2113_v9 = vpack.c.bf16 %v2081_v8, %v2080_v7  ;;  %2514 = vmatprep.subr.bf16.mxu0 %v4323_v32 }
 0x40e   :  { %3567 = vmatmul.mubr.bf16.gmra.mrb[60].mxu0 %v2113_v9 }
 0x40f   :  { %2538 = vmatprep.mubr.bf16.mxu0 %v4195_v10 }
 0x411   :  { %v3516_v12 = vpop.f32.mrb[8].mxu0 }
 0x412   :  { %v2244_v13 = vpop.f32.mrb[9].mxu0 }
 0x413   :  { %v3517_v14 = vpop.f32.mrb[10].mxu0 }
 0x414   :  { %v2472_v15 = vpack.c.bf16 %v3517_v14, %v3516_v12  ;;  %v2247_v11 = vpop.f32.mrb[11].mxu0  ;;  %v4207_v14 = vld [vmem:[%s5667_s0 + $0xc4] ss:$16 sps:$4 sm:$0xff]  }
 0x415   :  { %v2471_v16 = vpack.c.bf16 %v2247_v11, %v2244_v13  ;;  %v4206_v13 = vld [vmem:[%s5667_s0 + $0xa0] ss:$16 sps:$4 sm:$0xff]   ;;  %v4209_v11 = vld [vmem:[%s5667_s0 + $0xe4] ss:$16 sps:$4 sm:$0xff]  }
 0x417   :  { %2515 = vmatpush1.bf16.msra.mxu0 %v2471_v16 }
 0x418   :  { %2516 = vmatprep.subr.bf16.mxu0 %v4323_v32 }
 0x41b   :  { %2517 = vmatpush1.bf16.msra.mxu0 %v2472_v15  ;;  %v4208_v15 = vld [vmem:[%s5667_s0 + $0xc0] ss:$16 sps:$4 sm:$0xff]  }
 0x41c   :  { %2518 = vmatprep.subr.bf16.mxu0 %v4323_v32 }
 0x421   :  { %v3520_v17 = vpop.f32.mrb[12].mxu0 }
 0x422   :  { %v2260_v18 = vpop.f32.mrb[13].mxu0 }
 0x423   :  { %v3521_v19 = vpop.f32.mrb[14].mxu0 }
 0x424   :  { %v2474_v20 = vpack.c.bf16 %v3521_v19, %v3520_v17  ;;  %v2263_v21 = vpop.f32.mrb[15].mxu0 }
 0x425   :  { %v2473_v22 = vpack.c.bf16 %v2263_v21, %v2260_v18 }
 0x427   :  { %2519 = vmatpush1.bf16.msra.mxu0 %v2473_v22  ;;  %v4210_v22 = vld [vmem:[%s5667_s0 + $0xe0] ss:$16 sps:$4 sm:$0xff]  }
 0x428   :  { %2520 = vmatprep.subr.bf16.mxu0 %v4323_v32 }
 0x42b   :  { %2521 = vmatpush1.bf16.msra.mxu0 %v2474_v20 }
 0x42c   :  { %2522 = vmatprep.subr.bf16.mxu0 %v4323_v32 }
 0x431   :  { %v3524_v23 = vpop.f32.mrb[16].mxu0 }
 0x432   :  { %v2276_v24 = vpop.f32.mrb[17].mxu0 }
 0x433   :  { %v3525_v25 = vpop.f32.mrb[18].mxu0 }
 0x434   :  { %v2476_v26 = vpack.c.bf16 %v3525_v25, %v3524_v23  ;;  %v2279_v27 = vpop.f32.mrb[19].mxu0  ;;  %v4211_v23 = vld [vmem:[%s5667_s0 + $0x104] ss:$16 sps:$4 sm:$0xff]  }
 0x435   :  { %v2475_v28 = vpack.c.bf16 %v2279_v27, %v2276_v24  ;;  %v4212_v24 = vld [vmem:[%s5667_s0 + $0x100] ss:$16 sps:$4 sm:$0xff]   ;;  %v4213_v25 = vld [vmem:[%s5667_s0 + $0x124] ss:$16 sps:$4 sm:$0xff]  }
 0x437   :  { %2523 = vmatpush1.bf16.msra.mxu0 %v2475_v28 }
 0x438   :  { %2524 = vmatprep.subr.bf16.mxu0 %v4323_v32 }
 0x43b   :  { %2525 = vmatpush1.bf16.msra.mxu0 %v2476_v26 }
 0x43c   :  { %2526 = vmatprep.subr.bf16.mxu0 %v4323_v32 }
 0x441   :  { %v3528_v29 = vpop.f32.mrb[20].mxu0 }
 0x442   :  { %v2292_v30 = vpop.f32.mrb[21].mxu0 }
 0x443   :  { %v3529_v31 = vpop.f32.mrb[22].mxu0 }
 0x444   :  { %v2478_v33 = vpack.c.bf16 %v3529_v31, %v3528_v29  ;;  %v2295_v34 = vpop.f32.mrb[23].mxu0 }
 0x445   :  { %v2477_v35 = vpack.c.bf16 %v2295_v34, %v2292_v30  ;;  %v4215_v34 = vld [vmem:[%s5667_s0 + $0x144] ss:$16 sps:$4 sm:$0xff]  }
 0x447   :  { %2527 = vmatpush1.bf16.msra.mxu0 %v2477_v35  ;;  %v4216_v35 = vld [vmem:[%s5667_s0 + $0x140] ss:$16 sps:$4 sm:$0xff]  }
 0x448   :  { %2528 = vmatprep.subr.bf16.mxu0 %v4323_v32 }
 0x44b   :  { %2529 = vmatpush1.bf16.msra.mxu0 %v2478_v33  ;;  %v4214_v33 = vld [vmem:[%s5667_s0 + $0x120] ss:$16 sps:$4 sm:$0xff]  }
 0x44c   :  { %2530 = vmatprep.subr.bf16.mxu0 %v4323_v32 }
 0x451   :  { %v3532_v36 = vpop.f32.mrb[24].mxu0 }
 0x452   :  { %v2308_v37 = vpop.f32.mrb[25].mxu0 }
 0x453   :  { %v3533_v38 = vpop.f32.mrb[26].mxu0 }
 0x454   :  { %v2480_v39 = vpack.c.bf16 %v3533_v38, %v3532_v36  ;;  %v2311_v40 = vpop.f32.mrb[27].mxu0  ;;  %v4217_v36 = vld [vmem:[%s5667_s0 + $0x164] ss:$16 sps:$4 sm:$0xff]  }
 0x455   :  { %v2479_v41 = vpack.c.bf16 %v2311_v40, %v2308_v37 }
 0x457   :  { %2531 = vmatpush1.bf16.msra.mxu0 %v2479_v41 }
 0x458   :  { %2532 = vmatprep.subr.bf16.mxu0 %v4323_v32 }
 0x45b   :  { %2533 = vmatpush1.bf16.msra.mxu0 %v2480_v39 }
 0x45c   :  { %2534 = vmatprep.subr.bf16.mxu0 %v4323_v32 }
 0x461   :  { %v3536_v42 = vpop.f32.mrb[28].mxu0 }
 0x462   :  { %v2324_v43 = vpop.f32.mrb[29].mxu0 }
 0x463   :  { %v3537_v44 = vpop.f32.mrb[30].mxu0 }
 0x464   :  { %v2482_v45 = vpack.c.bf16 %v3537_v44, %v3536_v42  ;;  %v2327_v46 = vpop.f32.mrb[31].mxu0  ;;  %v4219_v44 = vld [vmem:[%s5667_s0 + $0x184] ss:$16 sps:$4 sm:$0xff]  }
 0x465   :  { %v2481_v47 = vpack.c.bf16 %v2327_v46, %v2324_v43  ;;  %v4218_v43 = vld [vmem:[%s5667_s0 + $0x160] ss:$16 sps:$4 sm:$0xff]   ;;  %v4221_v46 = vld [vmem:[%s5667_s0 + $0x1a4] ss:$16 sps:$4 sm:$0xff]  }
 0x467   :  { %2535 = vmatpush1.bf16.msra.mxu0 %v2481_v47 }
 0x468   :  { %2536 = vmatprep.subr.bf16.mxu0 %v4323_v32 }
 0x46b   :  { %2537 = vmatpush1.bf16.msra.mxu0 %v2482_v45  ;;  %v4220_v45 = vld [vmem:[%s5667_s0 + $0x180] ss:$16 sps:$4 sm:$0xff]  }
 0x46c   :  { %2795 = vmatprep.subr.bf16.mxu0 %v4323_v32 }
 0x46e   :  { %2539 = vmatmul.mubr.bf16.vlgmr.msra.gmra.mrb[64].mxu0 %v4196_v48 }
 0x46f   :  { %2546 = vmatprep.mubr.bf16.mxu0 %v4197_v49 }
 0x471   :  { %v3540_v50 = vpop.f32.mrb[32].mxu0 }
 0x472   :  { %v2340_v51 = vpop.f32.mrb[33].mxu0 }
 0x473   :  { %v3541_v52 = vpop.f32.mrb[34].mxu0 }
 0x474   :  { %v2484_v53 = vpack.c.bf16 %v3541_v52, %v3540_v50  ;;  %v2343_v54 = vpop.f32.mrb[35].mxu0 }
 0x475   :  { %v2483_v55 = vpack.c.bf16 %v2343_v54, %v2340_v51  ;;  %v4223_v54 = vld [vmem:[%s5667_s0 + $0x1c4] ss:$16 sps:$4 sm:$0xff]  }
 0x476   :  { %2547 = vmatmul.mubr.bf16.gmra.mrb[68].mxu0 %v4198_v56  ;;  %v4225_v56 = vld [vmem:[%s5667_s0 + $0x1e4] ss:$16 sps:$4 sm:$0xff]  }
 0x477   :  { %2796 = vmatpush1.bf16.msra.mxu0 %v2483_v55  ;;  %2554 = vmatprep.mubr.bf16.mxu0 %v4199_v57  ;;  %v4224_v55 = vld [vmem:[%s5667_s0 + $0x1c0] ss:$16 sps:$4 sm:$0xff]  }
 0x478   :  { %2797 = vmatprep.subr.bf16.mxu0 %v4323_v32 }
 0x47b   :  { %2798 = vmatpush1.bf16.msra.mxu0 %v2484_v53  ;;  %v4222_v53 = vld [vmem:[%s5667_s0 + $0x1a0] ss:$16 sps:$4 sm:$0xff]  }
 0x47c   :  { %2799 = vmatprep.subr.bf16.mxu0 %v4323_v32 }
 0x47e   :  { %2555 = vmatmul.mubr.bf16.gmra.mrb[72].mxu0 %v4200_v58 }
 0x47f   :  { %2562 = vmatprep.mubr.bf16.mxu0 %v4201_v59 }
 0x481   :  { %v3544_v60 = vpop.f32.mrb[36].mxu0 }
 0x482   :  { %v2356_v61 = vpop.f32.mrb[37].mxu0 }
 0x483   :  { %v3545_v62 = vpop.f32.mrb[38].mxu0 }
 0x484   :  { %v2486_v63 = vpack.c.bf16 %v3545_v62, %v3544_v60  ;;  %v2359_v0 = vpop.f32.mrb[39].mxu0 }
 0x485   :  { %v2485_v1 = vpack.c.bf16 %v2359_v0, %v2356_v61  ;;  %v4227_v0 = vld [vmem:[%s5667_s0 + $0x204] ss:$16 sps:$4 sm:$0xff]  }
 0x486   :  { %2563 = vmatmul.mubr.bf16.gmra.mrb[76].mxu0 %v4202_v2  ;;  %v4229_v2 = vld [vmem:[%s5667_s0 + $0x224] ss:$16 sps:$4 sm:$0xff]  }
 0x487   :  { %2800 = vmatpush1.bf16.msra.mxu0 %v2485_v1  ;;  %2570 = vmatprep.mubr.bf16.mxu0 %v4203_v3  ;;  %v4228_v1 = vld [vmem:[%s5667_s0 + $0x200] ss:$16 sps:$4 sm:$0xff]  }
 0x488   :  { %2801 = vmatprep.subr.bf16.mxu0 %v4323_v32  ;;  %v4230_v3 = vld [vmem:[%s5667_s0 + $0x220] ss:$16 sps:$4 sm:$0xff]  }
 0x48b   :  { %2802 = vmatpush1.bf16.msra.mxu0 %v2486_v63  ;;  %v4226_v63 = vld [vmem:[%s5667_s0 + $0x1e0] ss:$16 sps:$4 sm:$0xff]  }
 0x48c   :  { %2803 = vmatprep.subr.bf16.mxu0 %v4323_v32 }
 0x48e   :  { %2571 = vmatmul.mubr.bf16.gmra.mrb[80].mxu0 %v4204_v4  ;;  %v4232_v4 = vld [vmem:[%s5667_s0 + $0x240] ss:$16 sps:$4 sm:$0xff]  }
 0x48f   :  { %2578 = vmatprep.mubr.bf16.mxu0 %v4205_v5  ;;  %v4233_v5 = vld [vmem:[%s5667_s0 + $0x264] ss:$16 sps:$4 sm:$0xff]  }
 0x491   :  { %v3548_v6 = vpop.f32.mrb[40].mxu0 }
 0x492   :  { %v2372_v7 = vpop.f32.mrb[41].mxu0 }
 0x493   :  { %v3549_v8 = vpop.f32.mrb[42].mxu0 }
 0x494   :  { %v2488_v9 = vpack.c.bf16 %v3549_v8, %v3548_v6  ;;  %v2375_v10 = vpop.f32.mrb[43].mxu0  ;;  %v4234_v6 = vld [vmem:[%s5667_s0 + $0x260] ss:$16 sps:$4 sm:$0xff]  }
 0x495   :  { %v2487_v12 = vpack.c.bf16 %v2375_v10, %v2372_v7  ;;  %v4235_v7 = vld [vmem:[%s5667_s0 + $0x284] ss:$16 sps:$4 sm:$0xff]   ;;  %v4236_v8 = vld [vmem:[%s5667_s0 + $0x280] ss:$16 sps:$4 sm:$0xff]  }
 0x496   :  { %2579 = vmatmul.mubr.bf16.gmra.mrb[84].mxu0 %v4206_v13  ;;  %v4238_v10 = vld [vmem:[%s5667_s0 + $0x2a0] ss:$16 sps:$4 sm:$0xff]  }
 0x497   :  { %2804 = vmatpush1.bf16.msra.mxu0 %v2487_v12  ;;  %2586 = vmatprep.mubr.bf16.mxu0 %v4207_v14  ;;  %v4239_v12 = vld [vmem:[%s5667_s0 + $0x2c4] ss:$16 sps:$4 sm:$0xff]   ;;  %v4240_v13 = vld [vmem:[%s5667_s0 + $0x2c0] ss:$16 sps:$4 sm:$0xff]  }
 0x498   :  { %2805 = vmatprep.subr.bf16.mxu0 %v4323_v32  ;;  %v4241_v14 = vld [vmem:[%s5667_s0 + $0x2e4] ss:$16 sps:$4 sm:$0xff]  }
 0x49b   :  { %2806 = vmatpush1.bf16.msra.mxu0 %v2488_v9  ;;  %v4237_v9 = vld [vmem:[%s5667_s0 + $0x2a4] ss:$16 sps:$4 sm:$0xff]  }
 0x49c   :  { %2807 = vmatprep.subr.bf16.mxu0 %v4323_v32 }
 0x49e   :  { %2587 = vmatmul.mubr.bf16.gmra.mrb[88].mxu0 %v4208_v15  ;;  %v4242_v15 = vld [vmem:[%s5667_s0 + $0x2e0] ss:$16 sps:$4 sm:$0xff]  }
 0x49f   :  { %2594 = vmatprep.mubr.bf16.mxu0 %v4209_v11  ;;  %v4243_v11 = vld [vmem:[%s5667_s0 + $0x304] ss:$16 sps:$4 sm:$0xff]  }
 0x4a1   :  { %v3552_v16 = vpop.f32.mrb[44].mxu0 }
 0x4a2   :  { %v2388_v17 = vpop.f32.mrb[45].mxu0 }
 0x4a3   :  { %v3553_v18 = vpop.f32.mrb[46].mxu0 }
 0x4a4   :  { %v2490_v19 = vpack.c.bf16 %v3553_v18, %v3552_v16  ;;  %v2391_v20 = vpop.f32.mrb[47].mxu0  ;;  %v4244_v16 = vld [vmem:[%s5667_s0 + $0x300] ss:$16 sps:$4 sm:$0xff]  }
 0x4a5   :  { %v2489_v21 = vpack.c.bf16 %v2391_v20, %v2388_v17  ;;  %v4245_v17 = vld [vmem:[%s5667_s0 + $0x324] ss:$16 sps:$4 sm:$0xff]   ;;  %v4246_v18 = vld [vmem:[%s5667_s0 + $0x320] ss:$16 sps:$4 sm:$0xff]  }
 0x4a6   :  { %2595 = vmatmul.mubr.bf16.gmra.mrb[92].mxu0 %v4210_v22  ;;  %v4248_v20 = vld [vmem:[%s5667_s0 + $0x340] ss:$16 sps:$4 sm:$0xff]  }
 0x4a7   :  { %2808 = vmatpush1.bf16.msra.mxu0 %v2489_v21  ;;  %2602 = vmatprep.mubr.bf16.mxu0 %v4211_v23  ;;  %v4249_v21 = vld [vmem:[%s5667_s0 + $0x364] ss:$16 sps:$4 sm:$0xff]   ;;  %v4250_v22 = vld [vmem:[%s5667_s0 + $0x360] ss:$16 sps:$4 sm:$0xff]  }
 0x4a8   :  { %2809 = vmatprep.subr.bf16.mxu0 %v4323_v32  ;;  %v4251_v23 = vld [vmem:[%s5667_s0 + $0x384] ss:$16 sps:$4 sm:$0xff]  }
 0x4ab   :  { %2810 = vmatpush1.bf16.msra.mxu0 %v2490_v19  ;;  %v4247_v19 = vld [vmem:[%s5667_s0 + $0x344] ss:$16 sps:$4 sm:$0xff]  }
 0x4ac   :  { %2811 = vmatprep.subr.bf16.mxu0 %v4323_v32 }
 0x4ae   :  { %2603 = vmatmul.mubr.bf16.gmra.mrb[96].mxu0 %v4212_v24  ;;  %v4252_v24 = vld [vmem:[%s5667_s0 + $0x380] ss:$16 sps:$4 sm:$0xff]  }
 0x4af   :  { %2610 = vmatprep.mubr.bf16.mxu0 %v4213_v25  ;;  %v4253_v25 = vld [vmem:[%s5667_s0 + $0x3a4] ss:$16 sps:$4 sm:$0xff]  }
 0x4b1   :  { %v3556_v26 = vpop.f32.mrb[48].mxu0 }
 0x4b2   :  { %v2404_v27 = vpop.f32.mrb[49].mxu0 }
 0x4b3   :  { %v3557_v28 = vpop.f32.mrb[50].mxu0 }
 0x4b4   :  { %v2492_v29 = vpack.c.bf16 %v3557_v28, %v3556_v26  ;;  %v2407_v30 = vpop.f32.mrb[51].mxu0  ;;  %v4254_v26 = vld [vmem:[%s5667_s0 + $0x3a0] ss:$16 sps:$4 sm:$0xff]  }
 0x4b5   :  { %v2491_v31 = vpack.c.bf16 %v2407_v30, %v2404_v27  ;;  %v4255_v27 = vld [vmem:[%s5667_s0 + $0x3c4] ss:$16 sps:$4 sm:$0xff]   ;;  %v4256_v28 = vld [vmem:[%s5667_s0 + $0x3c0] ss:$16 sps:$4 sm:$0xff]  }
 0x4b6   :  { %2611 = vmatmul.mubr.bf16.gmra.mrb[100].mxu0 %v4214_v33  ;;  %v4258_v30 = vld [vmem:[%s5667_s0 + $0x3e0] ss:$16 sps:$4 sm:$0xff]   ;;  %v4260_v33 = vld [vmem:[%s5667_s0 + $0x8] ss:$16 sps:$4 sm:$0xff]  }
 0x4b7   :  { %2812 = vmatpush1.bf16.msra.mxu0 %v2491_v31  ;;  %2618 = vmatprep.mubr.bf16.mxu0 %v4215_v34  ;;  %v4259_v31 = vld [vmem:[%s5667_s0 + $0xc] ss:$16 sps:$4 sm:$0xff]  }
 0x4b8   :  { %2813 = vmatprep.subr.bf16.mxu0 %v4323_v32  ;;  %v4261_v34 = vld [vmem:[%s5667_s0 + $0x2c] ss:$16 sps:$4 sm:$0xff]  }
 0x4bb   :  { %2814 = vmatpush1.bf16.msra.mxu0 %v2492_v29  ;;  %v4257_v29 = vld [vmem:[%s5667_s0 + $0x3e4] ss:$16 sps:$4 sm:$0xff]  }
 0x4bc   :  { %2815 = vmatprep.subr.bf16.mxu0 %v4323_v32 }
 0x4be   :  { %2619 = vmatmul.mubr.bf16.gmra.mrb[104].mxu0 %v4216_v35  ;;  %v4262_v35 = vld [vmem:[%s5667_s0 + $0x28] ss:$16 sps:$4 sm:$0xff]  }
 0x4bf   :  { %2626 = vmatprep.mubr.bf16.mxu0 %v4217_v36  ;;  %v4263_v36 = vld [vmem:[%s5667_s0 + $0x4c] ss:$16 sps:$4 sm:$0xff]  }
 0x4c1   :  { %v3560_v37 = vpop.f32.mrb[52].mxu0 }
 0x4c2   :  { %v2420_v38 = vpop.f32.mrb[53].mxu0 }
 0x4c3   :  { %v3561_v39 = vpop.f32.mrb[54].mxu0 }
 0x4c4   :  { %v2494_v40 = vpack.c.bf16 %v3561_v39, %v3560_v37  ;;  %v2423_v41 = vpop.f32.mrb[55].mxu0  ;;  %v4264_v37 = vld [vmem:[%s5667_s0 + $0x48] ss:$16 sps:$4 sm:$0xff]  }
 0x4c5   :  { %v2493_v42 = vpack.c.bf16 %v2423_v41, %v2420_v38  ;;  %v4265_v38 = vld [vmem:[%s5667_s0 + $0x6c] ss:$16 sps:$4 sm:$0xff]   ;;  %v4266_v39 = vld [vmem:[%s5667_s0 + $0x68] ss:$16 sps:$4 sm:$0xff]  }
 0x4c6   :  { %2627 = vmatmul.mubr.bf16.gmra.mrb[108].mxu0 %v4218_v43  ;;  %v4268_v41 = vld [vmem:[%s5667_s0 + $0x88] ss:$16 sps:$4 sm:$0xff]  }
 0x4c7   :  { %2816 = vmatpush1.bf16.msra.mxu0 %v2493_v42  ;;  %2634 = vmatprep.mubr.bf16.mxu0 %v4219_v44  ;;  %v4269_v42 = vld [vmem:[%s5667_s0 + $0xac] ss:$16 sps:$4 sm:$0xff]   ;;  %v4270_v43 = vld [vmem:[%s5667_s0 + $0xa8] ss:$16 sps:$4 sm:$0xff]  }
 0x4c8   :  { %2817 = vmatprep.subr.bf16.mxu0 %v4323_v32  ;;  %v4271_v44 = vld [vmem:[%s5667_s0 + $0xcc] ss:$16 sps:$4 sm:$0xff]  }
 0x4cb   :  { %2818 = vmatpush1.bf16.msra.mxu0 %v2494_v40  ;;  %v4267_v40 = vld [vmem:[%s5667_s0 + $0x8c] ss:$16 sps:$4 sm:$0xff]  }
 0x4cc   :  { %2819 = vmatprep.subr.bf16.mxu0 %v4323_v32 }
 0x4ce   :  { %2635 = vmatmul.mubr.bf16.gmra.mrb[112].mxu0 %v4220_v45  ;;  %v4272_v45 = vld [vmem:[%s5667_s0 + $0xc8] ss:$16 sps:$4 sm:$0xff]  }
 0x4cf   :  { %2642 = vmatprep.mubr.bf16.mxu0 %v4221_v46  ;;  %v4273_v46 = vld [vmem:[%s5667_s0 + $0xec] ss:$16 sps:$4 sm:$0xff]  }
 0x4d1   :  { %v3564_v47 = vpop.f32.mrb[56].mxu0 }
 0x4d2   :  { %v2436_v48 = vpop.f32.mrb[57].mxu0 }
 0x4d3   :  { %v3565_v49 = vpop.f32.mrb[58].mxu0 }
 0x4d4   :  { %v2496_v50 = vpack.c.bf16 %v3565_v49, %v3564_v47  ;;  %v2439_v51 = vpop.f32.mrb[59].mxu0  ;;  %v4274_v47 = vld [vmem:[%s5667_s0 + $0xe8] ss:$16 sps:$4 sm:$0xff]  }
 0x4d5   :  { %v2495_v52 = vpack.c.bf16 %v2439_v51, %v2436_v48  ;;  %v4275_v48 = vld [vmem:[%s5667_s0 + $0x10c] ss:$16 sps:$4 sm:$0xff]   ;;  %v4276_v49 = vld [vmem:[%s5667_s0 + $0x108] ss:$16 sps:$4 sm:$0xff]  }
 0x4d6   :  { %2643 = vmatmul.mubr.bf16.gmra.mrb[116].mxu0 %v4222_v53  ;;  %v4278_v51 = vld [vmem:[%s5667_s0 + $0x128] ss:$16 sps:$4 sm:$0xff]  }
 0x4d7   :  { %2820 = vmatpush1.bf16.msra.mxu0 %v2495_v52  ;;  %2650 = vmatprep.mubr.bf16.mxu0 %v4223_v54  ;;  %v4279_v52 = vld [vmem:[%s5667_s0 + $0x14c] ss:$16 sps:$4 sm:$0xff]   ;;  %v4280_v53 = vld [vmem:[%s5667_s0 + $0x148] ss:$16 sps:$4 sm:$0xff]  }
 0x4d8   :  { %2821 = vmatprep.subr.bf16.mxu0 %v4323_v32  ;;  %v4281_v54 = vld [vmem:[%s5667_s0 + $0x16c] ss:$16 sps:$4 sm:$0xff]  }
 0x4db   :  { %2822 = vmatpush1.bf16.msra.mxu0 %v2496_v50  ;;  %v4277_v50 = vld [vmem:[%s5667_s0 + $0x12c] ss:$16 sps:$4 sm:$0xff]  }
 0x4dc   :  { %2823 = vmatprep.subr.bf16.mxu0 %v4323_v32 }
 0x4de   :  { %2651 = vmatmul.mubr.bf16.gmra.mrb[120].mxu0 %v4224_v55  ;;  %v4282_v55 = vld [vmem:[%s5667_s0 + $0x168] ss:$16 sps:$4 sm:$0xff]  }
 0x4df   :  { %2658 = vmatprep.mubr.bf16.mxu0 %v4225_v56  ;;  %v4283_v56 = vld [vmem:[%s5667_s0 + $0x18c] ss:$16 sps:$4 sm:$0xff]  }
 0x4e1   :  { %v3568_v57 = vpop.f32.mrb[60].mxu0 }
 0x4e2   :  { %v2452_v58 = vpop.f32.mrb[61].mxu0 }
 0x4e3   :  { %v3569_v59 = vpop.f32.mrb[62].mxu0 }
 0x4e4   :  { %v2498_v60 = vpack.c.bf16 %v3569_v59, %v3568_v57  ;;  %v2455_v61 = vpop.f32.mrb[63].mxu0  ;;  %v4284_v57 = vld [vmem:[%s5667_s0 + $0x188] ss:$16 sps:$4 sm:$0xff]  }
 0x4e5   :  { %v2497_v62 = vpack.c.bf16 %v2455_v61, %v2452_v58  ;;  %v4285_v58 = vld [vmem:[%s5667_s0 + $0x1ac] ss:$16 sps:$4 sm:$0xff]   ;;  %v4286_v59 = vld [vmem:[%s5667_s0 + $0x1a8] ss:$16 sps:$4 sm:$0xff]  }
 0x4e6   :  { %2659 = vmatmul.mubr.bf16.gmra.mrb[124].mxu0 %v4226_v63  ;;  %v4288_v61 = vld [vmem:[%s5667_s0 + $0x1c8] ss:$16 sps:$4 sm:$0xff]  }
 0x4e7   :  { %2824 = vmatpush1.bf16.msra.mxu0 %v2497_v62  ;;  %2666 = vmatprep.mubr.bf16.mxu0 %v4227_v0  ;;  %v4289_v62 = vld [vmem:[%s5667_s0 + $0x1ec] ss:$16 sps:$4 sm:$0xff]   ;;  %v4290_v63 = vld [vmem:[%s5667_s0 + $0x1e8] ss:$16 sps:$4 sm:$0xff]  }
 0x4e8   :  { %2825 = vmatprep.subr.bf16.mxu0 %v4323_v32  ;;  %v4231_v32 = vld [vmem:[%s5667_s0 + $0x244] ss:$16 sps:$4 sm:$0xff]   ;;  %v4291_v0 = vld [vmem:[%s5667_s0 + $0x20c] ss:$16 sps:$4 sm:$0xff]  }
 0x4eb   :  { %2826 = vmatpush1.bf16.msra.mxu0 %v2498_v60  ;;  %v4287_v60 = vld [vmem:[%s5667_s0 + $0x1cc] ss:$16 sps:$4 sm:$0xff]  }
 0x4ee   :  { %2667 = vmatmul.mubr.bf16.gmra.mrb[128].mxu0 %v4228_v1  ;;  %v4292_v1 = vld [vmem:[%s5667_s0 + $0x208] ss:$16 sps:$4 sm:$0xff]  }
 0x4ef   :  { %2674 = vmatprep.mubr.bf16.mxu0 %v4229_v2  ;;  %v4293_v2 = vld [vmem:[%s5667_s0 + $0x22c] ss:$16 sps:$4 sm:$0xff]  }
 0x4f6   :  { %2675 = vmatmul.mubr.bf16.gmra.mrb[132].mxu0 %v4230_v3  ;;  %v4294_v3 = vld [vmem:[%s5667_s0 + $0x228] ss:$16 sps:$4 sm:$0xff]  }
 0x4f7   :  { %2682 = vmatprep.mubr.bf16.mxu0 %v4231_v32  ;;  %v4295_v32 = vld [vmem:[%s5667_s0 + $0x24c] ss:$16 sps:$4 sm:$0xff]  }
 0x4fe   :  { %2683 = vmatmul.mubr.bf16.gmra.mrb[136].mxu0 %v4232_v4  ;;  %v4296_v4 = vld [vmem:[%s5667_s0 + $0x248] ss:$16 sps:$4 sm:$0xff]  }
 0x4ff   :  { %2690 = vmatprep.mubr.bf16.mxu0 %v4233_v5  ;;  %v4297_v5 = vld [vmem:[%s5667_s0 + $0x26c] ss:$16 sps:$4 sm:$0xff]  }
 0x506   :  { %2691 = vmatmul.mubr.bf16.gmra.mrb[140].mxu0 %v4234_v6  ;;  %v4298_v6 = vld [vmem:[%s5667_s0 + $0x268] ss:$16 sps:$4 sm:$0xff]  }
 0x507   :  { %2698 = vmatprep.mubr.bf16.mxu0 %v4235_v7  ;;  %v4299_v7 = vld [vmem:[%s5667_s0 + $0x28c] ss:$16 sps:$4 sm:$0xff]  }
 0x50e   :  { %2699 = vmatmul.mubr.bf16.gmra.mrb[144].mxu0 %v4236_v8  ;;  %v4300_v8 = vld [vmem:[%s5667_s0 + $0x288] ss:$16 sps:$4 sm:$0xff]  }
 0x50f   :  { %2706 = vmatprep.mubr.bf16.mxu0 %v4237_v9  ;;  %v4301_v9 = vld [vmem:[%s5667_s0 + $0x2ac] ss:$16 sps:$4 sm:$0xff]  }
 0x516   :  { %2707 = vmatmul.mubr.bf16.gmra.mrb[148].mxu0 %v4238_v10  ;;  %v4302_v10 = vld [vmem:[%s5667_s0 + $0x2a8] ss:$16 sps:$4 sm:$0xff]  }
 0x517   :  { %2714 = vmatprep.mubr.bf16.mxu0 %v4239_v12  ;;  %v4303_v12 = vld [vmem:[%s5667_s0 + $0x2cc] ss:$16 sps:$4 sm:$0xff]  }
 0x51e   :  { %2715 = vmatmul.mubr.bf16.gmra.mrb[152].mxu0 %v4240_v13  ;;  %v4304_v13 = vld [vmem:[%s5667_s0 + $0x2c8] ss:$16 sps:$4 sm:$0xff]  }
 0x51f   :  { %2722 = vmatprep.mubr.bf16.mxu0 %v4241_v14  ;;  %v4305_v14 = vld [vmem:[%s5667_s0 + $0x2ec] ss:$16 sps:$4 sm:$0xff]  }
 0x526   :  { %2723 = vmatmul.mubr.bf16.gmra.mrb[156].mxu0 %v4242_v15  ;;  %v4306_v15 = vld [vmem:[%s5667_s0 + $0x2e8] ss:$16 sps:$4 sm:$0xff]  }
 0x527   :  { %2730 = vmatprep.mubr.bf16.mxu0 %v4243_v11  ;;  %v4307_v11 = vld [vmem:[%s5667_s0 + $0x30c] ss:$16 sps:$4 sm:$0xff]  }
 0x52e   :  { %2731 = vmatmul.mubr.bf16.gmra.mrb[160].mxu0 %v4244_v16  ;;  %v4308_v16 = vld [vmem:[%s5667_s0 + $0x308] ss:$16 sps:$4 sm:$0xff]  }
 0x52f   :  { %2738 = vmatprep.mubr.bf16.mxu0 %v4245_v17  ;;  %v4309_v17 = vld [vmem:[%s5667_s0 + $0x32c] ss:$16 sps:$4 sm:$0xff]  }
 0x536   :  { %2739 = vmatmul.mubr.bf16.gmra.mrb[164].mxu0 %v4246_v18  ;;  %v4310_v18 = vld [vmem:[%s5667_s0 + $0x328] ss:$16 sps:$4 sm:$0xff]  }
 0x537   :  { %2746 = vmatprep.mubr.bf16.mxu0 %v4247_v19  ;;  %v4311_v19 = vld [vmem:[%s5667_s0 + $0x34c] ss:$16 sps:$4 sm:$0xff]  }
 0x53e   :  { %2747 = vmatmul.mubr.bf16.gmra.mrb[168].mxu0 %v4248_v20  ;;  %v4312_v20 = vld [vmem:[%s5667_s0 + $0x348] ss:$16 sps:$4 sm:$0xff]  }
 0x53f   :  { %2754 = vmatprep.mubr.bf16.mxu0 %v4249_v21  ;;  %v5377_v21 = vld [vmem:[%s5670_s5] ss:$0 sm:$0xff] }
 0x546   :  { %2755 = vmatmul.mubr.bf16.gmra.mrb[172].mxu0 %v4250_v22  ;;  %v4313_v22 = vld [vmem:[%s5667_s0 + $0x36c] ss:$16 sps:$4 sm:$0xff]  }
 0x547   :  { %2762 = vmatprep.mubr.bf16.mxu0 %v4251_v23 }
 0x54e   :  { %2763 = vmatmul.mubr.bf16.gmra.mrb[176].mxu0 %v4252_v24 }
 0x54f   :  { %2770 = vmatprep.mubr.bf16.mxu0 %v4253_v25 }
 0x556   :  { %2771 = vmatmul.mubr.bf16.gmra.mrb[180].mxu0 %v4254_v26 }
 0x557   :  { %2778 = vmatprep.mubr.bf16.mxu0 %v4255_v27 }
 0x55e   :  { %2779 = vmatmul.mubr.bf16.gmra.mrb[184].mxu0 %v4256_v28 }
 0x55f   :  { %2786 = vmatprep.mubr.bf16.mxu0 %v4257_v29  ;;  %v4314_v29 = vld [vmem:[%s5667_s0 + $0x368] ss:$16 sps:$4 sm:$0xff]  }
 0x566   :  { %2787 = vmatmul.mubr.bf16.gmra.mrb[188].mxu0 %v4258_v30  ;;  %v4315_v30 = vld [vmem:[%s5667_s0 + $0x38c] ss:$16 sps:$4 sm:$0xff]  }
 0x567   :  { %2827 = vmatprep.mubr.bf16.mxu0 %v4259_v31 }
 0x56e   :  { %2828 = vmatmul.mubr.bf16.vlgmr.msra.gmra.mrb[64].mxu0 %v4260_v33 }
 0x56f   :  { %2835 = vmatprep.mubr.bf16.mxu0 %v4261_v34 }
 0x576   :  { %2836 = vmatmul.mubr.bf16.gmra.mrb[68].mxu0 %v4262_v35 }
 0x577   :  { %2843 = vmatprep.mubr.bf16.mxu0 %v4263_v36 }
 0x57e   :  { %2844 = vmatmul.mubr.bf16.gmra.mrb[72].mxu0 %v4264_v37 }
 0x57f   :  { %2851 = vmatprep.mubr.bf16.mxu0 %v4265_v38  ;;  %v4316_v38 = vld [vmem:[%s5667_s0 + $0x388] ss:$16 sps:$4 sm:$0xff]  }
 0x586   :  { %2852 = vmatmul.mubr.bf16.gmra.mrb[76].mxu0 %v4266_v39  ;;  %v4317_v39 = vld [vmem:[%s5667_s0 + $0x3ac] ss:$16 sps:$4 sm:$0xff]  }
 0x587   :  { %2859 = vmatprep.mubr.bf16.mxu0 %v4267_v40 }
 0x58e   :  { %2860 = vmatmul.mubr.bf16.gmra.mrb[80].mxu0 %v4268_v41 }
 0x58f   :  { %2867 = vmatprep.mubr.bf16.mxu0 %v4269_v42 }
 0x596   :  { %2868 = vmatmul.mubr.bf16.gmra.mrb[84].mxu0 %v4270_v43 }
 0x597   :  { %2875 = vmatprep.mubr.bf16.mxu0 %v4271_v44 }
 0x59e   :  { %2876 = vmatmul.mubr.bf16.gmra.mrb[88].mxu0 %v4272_v45 }
 0x59f   :  { %2883 = vmatprep.mubr.bf16.mxu0 %v4273_v46  ;;  %v4318_v46 = vld [vmem:[%s5667_s0 + $0x3a8] ss:$16 sps:$4 sm:$0xff]  }
 0x5a6   :  { %2884 = vmatmul.mubr.bf16.gmra.mrb[92].mxu0 %v4274_v47  ;;  %v4319_v47 = vld [vmem:[%s5667_s0 + $0x3cc] ss:$16 sps:$4 sm:$0xff]  }
 0x5a7   :  { %2891 = vmatprep.mubr.bf16.mxu0 %v4275_v48 }
 0x5ae   :  { %2892 = vmatmul.mubr.bf16.gmra.mrb[96].mxu0 %v4276_v49 }
 0x5af   :  { %2899 = vmatprep.mubr.bf16.mxu0 %v4277_v50 }
 0x5b6   :  { %2900 = vmatmul.mubr.bf16.gmra.mrb[100].mxu0 %v4278_v51 }
 0x5b7   :  { %2907 = vmatprep.mubr.bf16.mxu0 %v4279_v52 }
 0x5be   :  { %2908 = vmatmul.mubr.bf16.gmra.mrb[104].mxu0 %v4280_v53 }
 0x5bf   :  { %2915 = vmatprep.mubr.bf16.mxu0 %v4281_v54  ;;  %v4320_v54 = vld [vmem:[%s5667_s0 + $0x3c8] ss:$16 sps:$4 sm:$0xff]  }
 0x5c6   :  { %2916 = vmatmul.mubr.bf16.gmra.mrb[108].mxu0 %v4282_v55  ;;  %v4321_v55 = vld [vmem:[%s5667_s0 + $0x3ec] ss:$16 sps:$4 sm:$0xff]  }
 0x5c7   :  { %2923 = vmatprep.mubr.bf16.mxu0 %v4283_v56 }
 0x5ce   :  { %2924 = vmatmul.mubr.bf16.gmra.mrb[112].mxu0 %v4284_v57 }
 0x5cf   :  { %2931 = vmatprep.mubr.bf16.mxu0 %v4285_v58 }
 0x5d6   :  { %2932 = vmatmul.mubr.bf16.gmra.mrb[116].mxu0 %v4286_v59 }
 0x5d7   :  { %2939 = vmatprep.mubr.bf16.mxu0 %v4287_v60 }
 0x5de   :  { %2940 = vmatmul.mubr.bf16.gmra.mrb[120].mxu0 %v4288_v61 }
 0x5df   :  { %2947 = vmatprep.mubr.bf16.mxu0 %v4289_v62  ;;  %v4322_v62 = vld [vmem:[%s5667_s0 + $0x3e8] ss:$16 sps:$4 sm:$0xff]  }
 0x5e6   :  { %2948 = vmatmul.mubr.bf16.gmra.mrb[124].mxu0 %v4290_v63 }
 0x5e7   :  { %2955 = vmatprep.mubr.bf16.mxu0 %v4291_v0 }
 0x5ee   :  { %2956 = vmatmul.mubr.bf16.gmra.mrb[128].mxu0 %v4292_v1 }
 0x5ef   :  { %2963 = vmatprep.mubr.bf16.mxu0 %v4293_v2 }
 0x5f6   :  { %2964 = vmatmul.mubr.bf16.gmra.mrb[132].mxu0 %v4294_v3 }
 0x5f7   :  { %2971 = vmatprep.mubr.bf16.mxu0 %v4295_v32 }
 0x5fe   :  { %2972 = vmatmul.mubr.bf16.gmra.mrb[136].mxu0 %v4296_v4 }
 0x5ff   :  { %2979 = vmatprep.mubr.bf16.mxu0 %v4297_v5 }
 0x606   :  { %2980 = vmatmul.mubr.bf16.gmra.mrb[140].mxu0 %v4298_v6 }
 0x607   :  { %2987 = vmatprep.mubr.bf16.mxu0 %v4299_v7 }
 0x60e   :  { %2988 = vmatmul.mubr.bf16.gmra.mrb[144].mxu0 %v4300_v8 }
 0x60f   :  { %2995 = vmatprep.mubr.bf16.mxu0 %v4301_v9 }
 0x616   :  { %2996 = vmatmul.mubr.bf16.gmra.mrb[148].mxu0 %v4302_v10 }
 0x617   :  { %3003 = vmatprep.mubr.bf16.mxu0 %v4303_v12 }
 0x61e   :  { %3004 = vmatmul.mubr.bf16.gmra.mrb[152].mxu0 %v4304_v13 }
 0x61f   :  { %3011 = vmatprep.mubr.bf16.mxu0 %v4305_v14 }
 0x626   :  { %3012 = vmatmul.mubr.bf16.gmra.mrb[156].mxu0 %v4306_v15 }
 0x627   :  { %3019 = vmatprep.mubr.bf16.mxu0 %v4307_v11 }
 0x62e   :  { %3020 = vmatmul.mubr.bf16.gmra.mrb[160].mxu0 %v4308_v16 }
 0x62f   :  { %3027 = vmatprep.mubr.bf16.mxu0 %v4309_v17 }
 0x636   :  { %3028 = vmatmul.mubr.bf16.gmra.mrb[164].mxu0 %v4310_v18 }
 0x637   :  { %3035 = vmatprep.mubr.bf16.mxu0 %v4311_v19 }
 0x63e   :  { %3036 = vmatmul.mubr.bf16.gmra.mrb[168].mxu0 %v4312_v20 }
 0x63f   :  { %3043 = vmatprep.mubr.bf16.mxu0 %v4313_v22 }
 0x641   :  { %v2829_v23 = vpop.f32.mrb[64].mxu0 }
 0x642   :  { %v3634_v24 = vadd.f32 %v5377_v21, %v2829_v23  ;;  %v2831_v25 = vpop.f32.mrb[65].mxu0 }
 0x643   :  { %v2832_v26 = vpop.f32.mrb[66].mxu0 }
 0x644   :  { %3084 = vst [vmem:[%s5671_s6] sm:$0xff] %v3634_v24  ;;  %v3635_v27 = vadd.f32 %v5377_v21, %v2832_v26  ;;  %v2834_v28 = vpop.f32.mrb[67].mxu0 }
 0x646   :  { %3085 = vst [vmem:[%s5671_s6 + $0x8] sm:$0xff] %v3635_v27  ;;  %3044 = vmatmul.mubr.bf16.gmra.mrb[172].mxu0 %v4314_v29 }
 0x647   :  { %3051 = vmatprep.mubr.bf16.mxu0 %v4315_v30 }
 0x649   :  { %v2837_v31 = vpop.f32.mrb[68].mxu0 }
 0x64a   :  { %v3636_v33 = vadd.f32 %v5377_v21, %v2837_v31  ;;  %v2839_v34 = vpop.f32.mrb[69].mxu0 }
 0x64b   :  { %v2840_v35 = vpop.f32.mrb[70].mxu0 }
 0x64c   :  { %3086 = vst [vmem:[%s5671_s6 + $0x10] sm:$0xff] %v3636_v33  ;;  %v3637_v36 = vadd.f32 %v5377_v21, %v2840_v35  ;;  %v2842_v37 = vpop.f32.mrb[71].mxu0 }
 0x64e   :  { %3087 = vst [vmem:[%s5671_s6 + $0x18] sm:$0xff] %v3637_v36  ;;  %3052 = vmatmul.mubr.bf16.gmra.mrb[176].mxu0 %v4316_v38 }
 0x64f   :  { %3059 = vmatprep.mubr.bf16.mxu0 %v4317_v39 }
 0x651   :  { %v2845_v40 = vpop.f32.mrb[72].mxu0 }
 0x652   :  { %v3638_v41 = vadd.f32 %v5377_v21, %v2845_v40  ;;  %v2847_v42 = vpop.f32.mrb[73].mxu0 }
 0x653   :  { %v2848_v43 = vpop.f32.mrb[74].mxu0 }
 0x654   :  { %3088 = vst [vmem:[%s5671_s6 + $0x20] sm:$0xff] %v3638_v41  ;;  %v3639_v44 = vadd.f32 %v5377_v21, %v2848_v43  ;;  %v2850_v45 = vpop.f32.mrb[75].mxu0 }
 0x656   :  { %3089 = vst [vmem:[%s5671_s6 + $0x28] sm:$0xff] %v3639_v44  ;;  %3060 = vmatmul.mubr.bf16.gmra.mrb[180].mxu0 %v4318_v46 }
 0x657   :  { %3067 = vmatprep.mubr.bf16.mxu0 %v4319_v47 }
 0x659   :  { %v2853_v48 = vpop.f32.mrb[76].mxu0 }
 0x65a   :  { %v3640_v49 = vadd.f32 %v5377_v21, %v2853_v48  ;;  %v2855_v50 = vpop.f32.mrb[77].mxu0 }
 0x65b   :  { %v2856_v51 = vpop.f32.mrb[78].mxu0 }
 0x65c   :  { %3090 = vst [vmem:[%s5671_s6 + $0x30] sm:$0xff] %v3640_v49  ;;  %v3641_v52 = vadd.f32 %v5377_v21, %v2856_v51  ;;  %v2858_v53 = vpop.f32.mrb[79].mxu0 }
 0x65e   :  { %3091 = vst [vmem:[%s5671_s6 + $0x38] sm:$0xff] %v3641_v52  ;;  %3068 = vmatmul.mubr.bf16.gmra.mrb[184].mxu0 %v4320_v54 }
 0x65f   :  { %3075 = vmatprep.mubr.bf16.mxu0 %v4321_v55 }
 0x661   :  { %v2861_v56 = vpop.f32.mrb[80].mxu0 }
 0x662   :  { %v3642_v57 = vadd.f32 %v5377_v21, %v2861_v56  ;;  %v2863_v58 = vpop.f32.mrb[81].mxu0 }
 0x663   :  { %v2864_v59 = vpop.f32.mrb[82].mxu0 }
 0x664   :  { %3092 = vst [vmem:[%s5671_s6 + $0x40] sm:$0xff] %v3642_v57  ;;  %v3643_v60 = vadd.f32 %v5377_v21, %v2864_v59  ;;  %v2866_v61 = vpop.f32.mrb[83].mxu0 }
 0x666   :  { %3093 = vst [vmem:[%s5671_s6 + $0x48] sm:$0xff] %v3643_v60  ;;  %3076 = vmatmul.mubr.bf16.gmra.mrb[188].mxu0 %v4322_v62 }
 0x669   :  { %v2869_v63 = vpop.f32.mrb[84].mxu0 }
 0x66a   :  { %v3644_v0 = vadd.f32 %v5377_v21, %v2869_v63  ;;  %v2871_v1 = vpop.f32.mrb[85].mxu0 }
 0x66b   :  { %v2872_v2 = vpop.f32.mrb[86].mxu0 }
 0x66c   :  { %3094 = vst [vmem:[%s5671_s6 + $0x50] sm:$0xff] %v3644_v0  ;;  %v3645_v3 = vadd.f32 %v5377_v21, %v2872_v2  ;;  %v2874_v32 = vpop.f32.mrb[87].mxu0 }
 0x66e   :  { %3095 = vst [vmem:[%s5671_s6 + $0x58] sm:$0xff] %v3645_v3 }
 0x671   :  { %v2877_v4 = vpop.f32.mrb[88].mxu0 }
 0x672   :  { %v3646_v5 = vadd.f32 %v5377_v21, %v2877_v4  ;;  %v2879_v6 = vpop.f32.mrb[89].mxu0 }
 0x673   :  { %v2880_v7 = vpop.f32.mrb[90].mxu0 }
 0x674   :  { %3096 = vst [vmem:[%s5671_s6 + $0x60] sm:$0xff] %v3646_v5  ;;  %v3647_v8 = vadd.f32 %v5377_v21, %v2880_v7  ;;  %v2882_v9 = vpop.f32.mrb[91].mxu0 }
 0x676   :  { %3097 = vst [vmem:[%s5671_s6 + $0x68] sm:$0xff] %v3647_v8 }
 0x679   :  { %v2885_v10 = vpop.f32.mrb[92].mxu0 }
 0x67a   :  { %v3648_v12 = vadd.f32 %v5377_v21, %v2885_v10  ;;  %v2887_v13 = vpop.f32.mrb[93].mxu0 }
 0x67b   :  { %v2888_v14 = vpop.f32.mrb[94].mxu0 }
 0x67c   :  { %3098 = vst [vmem:[%s5671_s6 + $0x70] sm:$0xff] %v3648_v12  ;;  %v3649_v15 = vadd.f32 %v5377_v21, %v2888_v14  ;;  %v2890_v11 = vpop.f32.mrb[95].mxu0 }
 0x67e   :  { %3099 = vst [vmem:[%s5671_s6 + $0x78] sm:$0xff] %v3649_v15 }
 0x681   :  { %v2893_v16 = vpop.f32.mrb[96].mxu0 }
 0x682   :  { %v3650_v17 = vadd.f32 %v5377_v21, %v2893_v16  ;;  %v2895_v18 = vpop.f32.mrb[97].mxu0 }
 0x683   :  { %v2896_v19 = vpop.f32.mrb[98].mxu0 }
 0x684   :  { %3100 = vst [vmem:[%s5671_s6 + $0x80] sm:$0xff] %v3650_v17  ;;  %v3651_v20 = vadd.f32 %v5377_v21, %v2896_v19  ;;  %v2898_v22 = vpop.f32.mrb[99].mxu0 }
 0x686   :  { %3101 = vst [vmem:[%s5671_s6 + $0x88] sm:$0xff] %v3651_v20 }
 0x689   :  { %v2901_v23 = vpop.f32.mrb[100].mxu0 }
 0x68a   :  { %v3652_v24 = vadd.f32 %v5377_v21, %v2901_v23  ;;  %v2903_v25 = vpop.f32.mrb[101].mxu0 }
 0x68b   :  { %v2904_v26 = vpop.f32.mrb[102].mxu0 }
 0x68c   :  { %3102 = vst [vmem:[%s5671_s6 + $0x90] sm:$0xff] %v3652_v24  ;;  %v3653_v27 = vadd.f32 %v5377_v21, %v2904_v26  ;;  %v2906_v28 = vpop.f32.mrb[103].mxu0 }
 0x68e   :  { %3103 = vst [vmem:[%s5671_s6 + $0x98] sm:$0xff] %v3653_v27 }
 0x691   :  { %v2909_v29 = vpop.f32.mrb[104].mxu0 }
 0x692   :  { %v3654_v30 = vadd.f32 %v5377_v21, %v2909_v29  ;;  %v2911_v31 = vpop.f32.mrb[105].mxu0 }
 0x693   :  { %v2912_v33 = vpop.f32.mrb[106].mxu0 }
 0x694   :  { %3104 = vst [vmem:[%s5671_s6 + $0xa0] sm:$0xff] %v3654_v30  ;;  %v3655_v34 = vadd.f32 %v5377_v21, %v2912_v33  ;;  %v2914_v35 = vpop.f32.mrb[107].mxu0 }
 0x696   :  { %3105 = vst [vmem:[%s5671_s6 + $0xa8] sm:$0xff] %v3655_v34 }
 0x699   :  { %v2917_v36 = vpop.f32.mrb[108].mxu0 }
 0x69a   :  { %v3656_v37 = vadd.f32 %v5377_v21, %v2917_v36  ;;  %v2919_v38 = vpop.f32.mrb[109].mxu0 }
 0x69b   :  { %v2920_v39 = vpop.f32.mrb[110].mxu0 }
 0x69c   :  { %3106 = vst [vmem:[%s5671_s6 + $0xb0] sm:$0xff] %v3656_v37  ;;  %v3657_v40 = vadd.f32 %v5377_v21, %v2920_v39  ;;  %v2922_v41 = vpop.f32.mrb[111].mxu0 }
 0x69e   :  { %3107 = vst [vmem:[%s5671_s6 + $0xb8] sm:$0xff] %v3657_v40 }
 0x6a1   :  { %v2925_v42 = vpop.f32.mrb[112].mxu0 }
 0x6a2   :  { %v3658_v43 = vadd.f32 %v5377_v21, %v2925_v42  ;;  %v2927_v44 = vpop.f32.mrb[113].mxu0 }
 0x6a3   :  { %v2928_v45 = vpop.f32.mrb[114].mxu0 }
 0x6a4   :  { %3108 = vst [vmem:[%s5671_s6 + $0xc0] sm:$0xff] %v3658_v43  ;;  %v3659_v46 = vadd.f32 %v5377_v21, %v2928_v45  ;;  %v2930_v47 = vpop.f32.mrb[115].mxu0 }
 0x6a6   :  { %3109 = vst [vmem:[%s5671_s6 + $0xc8] sm:$0xff] %v3659_v46 }
 0x6a9   :  { %v2933_v48 = vpop.f32.mrb[116].mxu0 }
 0x6aa   :  { %v3660_v49 = vadd.f32 %v5377_v21, %v2933_v48  ;;  %v2935_v50 = vpop.f32.mrb[117].mxu0 }
 0x6ab   :  { %v2936_v51 = vpop.f32.mrb[118].mxu0 }
 0x6ac   :  { %3110 = vst [vmem:[%s5671_s6 + $0xd0] sm:$0xff] %v3660_v49  ;;  %v3661_v52 = vadd.f32 %v5377_v21, %v2936_v51  ;;  %v2938_v53 = vpop.f32.mrb[119].mxu0 }
 0x6ae   :  { %3111 = vst [vmem:[%s5671_s6 + $0xd8] sm:$0xff] %v3661_v52 }
 0x6b1   :  { %v2941_v54 = vpop.f32.mrb[120].mxu0 }
 0x6b2   :  { %v3662_v55 = vadd.f32 %v5377_v21, %v2941_v54  ;;  %v2943_v56 = vpop.f32.mrb[121].mxu0 }
 0x6b3   :  { %v2944_v57 = vpop.f32.mrb[122].mxu0 }
 0x6b4   :  { %3112 = vst [vmem:[%s5671_s6 + $0xe0] sm:$0xff] %v3662_v55  ;;  %v3663_v58 = vadd.f32 %v5377_v21, %v2944_v57  ;;  %v2946_v59 = vpop.f32.mrb[123].mxu0 }
 0x6b6   :  { %3113 = vst [vmem:[%s5671_s6 + $0xe8] sm:$0xff] %v3663_v58 }
 0x6b9   :  { %v2949_v60 = vpop.f32.mrb[124].mxu0 }
 0x6ba   :  { %v3664_v61 = vadd.f32 %v5377_v21, %v2949_v60  ;;  %v2951_v62 = vpop.f32.mrb[125].mxu0 }
 0x6bb   :  { %v2952_v63 = vpop.f32.mrb[126].mxu0 }
 0x6bc   :  { %3114 = vst [vmem:[%s5671_s6 + $0xf0] sm:$0xff] %v3664_v61  ;;  %v3665_v0 = vadd.f32 %v5377_v21, %v2952_v63  ;;  %v2954_v1 = vpop.f32.mrb[127].mxu0 }
 0x6be   :  { %3115 = vst [vmem:[%s5671_s6 + $0xf8] sm:$0xff] %v3665_v0 }
 0x6c1   :  { %v2957_v2 = vpop.f32.mrb[128].mxu0 }
 0x6c2   :  { %v3666_v3 = vadd.f32 %v5377_v21, %v2957_v2  ;;  %v2959_v32 = vpop.f32.mrb[129].mxu0 }
 0x6c3   :  { %v2960_v4 = vpop.f32.mrb[130].mxu0 }
 0x6c4   :  { %3116 = vst [vmem:[%s5671_s6 + $0x100] sm:$0xff] %v3666_v3  ;;  %v3667_v5 = vadd.f32 %v5377_v21, %v2960_v4  ;;  %v2962_v6 = vpop.f32.mrb[131].mxu0 }
 0x6c6   :  { %3117 = vst [vmem:[%s5671_s6 + $0x108] sm:$0xff] %v3667_v5 }
 0x6c9   :  { %v2965_v7 = vpop.f32.mrb[132].mxu0 }
 0x6ca   :  { %v3668_v8 = vadd.f32 %v5377_v21, %v2965_v7  ;;  %v2967_v9 = vpop.f32.mrb[133].mxu0 }
 0x6cb   :  { %v2968_v10 = vpop.f32.mrb[134].mxu0 }
 0x6cc   :  { %3118 = vst [vmem:[%s5671_s6 + $0x110] sm:$0xff] %v3668_v8  ;;  %v3669_v12 = vadd.f32 %v5377_v21, %v2968_v10  ;;  %v2970_v13 = vpop.f32.mrb[135].mxu0 }
 0x6ce   :  { %3119 = vst [vmem:[%s5671_s6 + $0x118] sm:$0xff] %v3669_v12 }
 0x6d1   :  { %v2973_v14 = vpop.f32.mrb[136].mxu0 }
 0x6d2   :  { %v3670_v15 = vadd.f32 %v5377_v21, %v2973_v14  ;;  %v2975_v11 = vpop.f32.mrb[137].mxu0 }
 0x6d3   :  { %v2976_v16 = vpop.f32.mrb[138].mxu0 }
 0x6d4   :  { %3120 = vst [vmem:[%s5671_s6 + $0x120] sm:$0xff] %v3670_v15  ;;  %v3671_v17 = vadd.f32 %v5377_v21, %v2976_v16  ;;  %v2978_v18 = vpop.f32.mrb[139].mxu0 }
 0x6d6   :  { %3121 = vst [vmem:[%s5671_s6 + $0x128] sm:$0xff] %v3671_v17 }
 0x6d9   :  { %v2981_v19 = vpop.f32.mrb[140].mxu0 }
 0x6da   :  { %v3672_v20 = vadd.f32 %v5377_v21, %v2981_v19  ;;  %v2983_v22 = vpop.f32.mrb[141].mxu0 }
 0x6db   :  { %v2984_v23 = vpop.f32.mrb[142].mxu0 }
 0x6dc   :  { %3122 = vst [vmem:[%s5671_s6 + $0x130] sm:$0xff] %v3672_v20  ;;  %v3673_v24 = vadd.f32 %v5377_v21, %v2984_v23  ;;  %v2986_v25 = vpop.f32.mrb[143].mxu0 }
 0x6de   :  { %3123 = vst [vmem:[%s5671_s6 + $0x138] sm:$0xff] %v3673_v24 }
 0x6e1   :  { %v2989_v26 = vpop.f32.mrb[144].mxu0 }
 0x6e2   :  { %v3674_v27 = vadd.f32 %v5377_v21, %v2989_v26  ;;  %v2991_v28 = vpop.f32.mrb[145].mxu0 }
 0x6e3   :  { %v2992_v29 = vpop.f32.mrb[146].mxu0 }
 0x6e4   :  { %3124 = vst [vmem:[%s5671_s6 + $0x140] sm:$0xff] %v3674_v27  ;;  %v3675_v30 = vadd.f32 %v5377_v21, %v2992_v29  ;;  %v2994_v31 = vpop.f32.mrb[147].mxu0 }
 0x6e6   :  { %3125 = vst [vmem:[%s5671_s6 + $0x148] sm:$0xff] %v3675_v30 }
 0x6e9   :  { %v2997_v33 = vpop.f32.mrb[148].mxu0 }
 0x6ea   :  { %v3676_v34 = vadd.f32 %v5377_v21, %v2997_v33  ;;  %v2999_v35 = vpop.f32.mrb[149].mxu0 }
 0x6eb   :  { %v3000_v36 = vpop.f32.mrb[150].mxu0 }
 0x6ec   :  { %3126 = vst [vmem:[%s5671_s6 + $0x150] sm:$0xff] %v3676_v34  ;;  %v3677_v37 = vadd.f32 %v5377_v21, %v3000_v36  ;;  %v3002_v38 = vpop.f32.mrb[151].mxu0 }
 0x6ee   :  { %3127 = vst [vmem:[%s5671_s6 + $0x158] sm:$0xff] %v3677_v37 }
 0x6f1   :  { %v3005_v39 = vpop.f32.mrb[152].mxu0 }
 0x6f2   :  { %v3678_v40 = vadd.f32 %v5377_v21, %v3005_v39  ;;  %v3007_v41 = vpop.f32.mrb[153].mxu0 }
 0x6f3   :  { %v3008_v42 = vpop.f32.mrb[154].mxu0 }
 0x6f4   :  { %3128 = vst [vmem:[%s5671_s6 + $0x160] sm:$0xff] %v3678_v40  ;;  %v3679_v43 = vadd.f32 %v5377_v21, %v3008_v42  ;;  %v3010_v44 = vpop.f32.mrb[155].mxu0 }
 0x6f6   :  { %3129 = vst [vmem:[%s5671_s6 + $0x168] sm:$0xff] %v3679_v43 }
 0x6f9   :  { %v3013_v45 = vpop.f32.mrb[156].mxu0 }
 0x6fa   :  { %v3680_v46 = vadd.f32 %v5377_v21, %v3013_v45  ;;  %v3015_v47 = vpop.f32.mrb[157].mxu0 }
 0x6fb   :  { %v3016_v48 = vpop.f32.mrb[158].mxu0 }
 0x6fc   :  { %3130 = vst [vmem:[%s5671_s6 + $0x170] sm:$0xff] %v3680_v46  ;;  %v3681_v49 = vadd.f32 %v5377_v21, %v3016_v48  ;;  %v3018_v50 = vpop.f32.mrb[159].mxu0 }
 0x6fe   :  { %3131 = vst [vmem:[%s5671_s6 + $0x178] sm:$0xff] %v3681_v49 }
 0x701   :  { %v3021_v51 = vpop.f32.mrb[160].mxu0 }
 0x702   :  { %v3682_v52 = vadd.f32 %v5377_v21, %v3021_v51  ;;  %v3023_v53 = vpop.f32.mrb[161].mxu0 }
 0x703   :  { %v3024_v54 = vpop.f32.mrb[162].mxu0 }
 0x704   :  { %3132 = vst [vmem:[%s5671_s6 + $0x180] sm:$0xff] %v3682_v52  ;;  %v3683_v55 = vadd.f32 %v5377_v21, %v3024_v54  ;;  %v3026_v56 = vpop.f32.mrb[163].mxu0 }
 0x706   :  { %3133 = vst [vmem:[%s5671_s6 + $0x188] sm:$0xff] %v3683_v55 }
 0x709   :  { %v3029_v57 = vpop.f32.mrb[164].mxu0 }
 0x70a   :  { %v3684_v58 = vadd.f32 %v5377_v21, %v3029_v57  ;;  %v3031_v59 = vpop.f32.mrb[165].mxu0 }
 0x70b   :  { %v3032_v60 = vpop.f32.mrb[166].mxu0 }
 0x70c   :  { %3134 = vst [vmem:[%s5671_s6 + $0x190] sm:$0xff] %v3684_v58  ;;  %v3685_v61 = vadd.f32 %v5377_v21, %v3032_v60  ;;  %v3034_v62 = vpop.f32.mrb[167].mxu0 }
 0x70e   :  { %3135 = vst [vmem:[%s5671_s6 + $0x198] sm:$0xff] %v3685_v61 }
 0x711   :  { %v3037_v63 = vpop.f32.mrb[168].mxu0 }
 0x712   :  { %v3686_v0 = vadd.f32 %v5377_v21, %v3037_v63  ;;  %v3039_v1 = vpop.f32.mrb[169].mxu0 }
 0x713   :  { %v3040_v2 = vpop.f32.mrb[170].mxu0 }
 0x714   :  { %3136 = vst [vmem:[%s5671_s6 + $0x1a0] sm:$0xff] %v3686_v0  ;;  %v3687_v3 = vadd.f32 %v5377_v21, %v3040_v2  ;;  %v3042_v32 = vpop.f32.mrb[171].mxu0 }
 0x716   :  { %3137 = vst [vmem:[%s5671_s6 + $0x1a8] sm:$0xff] %v3687_v3 }
 0x719   :  { %v3045_v4 = vpop.f32.mrb[172].mxu0 }
 0x71a   :  { %v3688_v5 = vadd.f32 %v5377_v21, %v3045_v4  ;;  %v3047_v6 = vpop.f32.mrb[173].mxu0 }
 0x71b   :  { %v3048_v7 = vpop.f32.mrb[174].mxu0 }
 0x71c   :  { %3138 = vst [vmem:[%s5671_s6 + $0x1b0] sm:$0xff] %v3688_v5  ;;  %v3689_v8 = vadd.f32 %v5377_v21, %v3048_v7  ;;  %v3050_v9 = vpop.f32.mrb[175].mxu0 }
 0x71e   :  { %3139 = vst [vmem:[%s5671_s6 + $0x1b8] sm:$0xff] %v3689_v8 }
 0x721   :  { %v3053_v10 = vpop.f32.mrb[176].mxu0 }
 0x722   :  { %v3690_v12 = vadd.f32 %v5377_v21, %v3053_v10  ;;  %v3055_v13 = vpop.f32.mrb[177].mxu0 }
 0x723   :  { %v3056_v14 = vpop.f32.mrb[178].mxu0 }
 0x724   :  { %3140 = vst [vmem:[%s5671_s6 + $0x1c0] sm:$0xff] %v3690_v12  ;;  %v3691_v15 = vadd.f32 %v5377_v21, %v3056_v14  ;;  %v3058_v11 = vpop.f32.mrb[179].mxu0 }
 0x726   :  { %3141 = vst [vmem:[%s5671_s6 + $0x1c8] sm:$0xff] %v3691_v15 }
 0x729   :  { %v3061_v16 = vpop.f32.mrb[180].mxu0 }
 0x72a   :  { %v3692_v17 = vadd.f32 %v5377_v21, %v3061_v16  ;;  %v3063_v18 = vpop.f32.mrb[181].mxu0 }
 0x72b   :  { %v3064_v19 = vpop.f32.mrb[182].mxu0 }
 0x72c   :  { %3142 = vst [vmem:[%s5671_s6 + $0x1d0] sm:$0xff] %v3692_v17  ;;  %v3693_v20 = vadd.f32 %v5377_v21, %v3064_v19  ;;  %v3066_v22 = vpop.f32.mrb[183].mxu0 }
 0x72e   :  { %3143 = vst [vmem:[%s5671_s6 + $0x1d8] sm:$0xff] %v3693_v20 }
 0x731   :  { %v3069_v23 = vpop.f32.mrb[184].mxu0 }
 0x732   :  { %v3694_v24 = vadd.f32 %v5377_v21, %v3069_v23  ;;  %v3071_v25 = vpop.f32.mrb[185].mxu0 }
 0x733   :  { %v3072_v26 = vpop.f32.mrb[186].mxu0 }
 0x734   :  { %3144 = vst [vmem:[%s5671_s6 + $0x1e0] sm:$0xff] %v3694_v24  ;;  %v3695_v27 = vadd.f32 %v5377_v21, %v3072_v26  ;;  %v3074_v28 = vpop.f32.mrb[187].mxu0 }
 0x736   :  { %3145 = vst [vmem:[%s5671_s6 + $0x1e8] sm:$0xff] %v3695_v27 }
 0x739   :  { %v3077_v29 = vpop.f32.mrb[188].mxu0 }
 0x73a   :  { %v3696_v30 = vadd.f32 %v5377_v21, %v3077_v29  ;;  %v3079_v31 = vpop.f32.mrb[189].mxu0 }
 0x73b   :  { %v3080_v33 = vpop.f32.mrb[190].mxu0 }
 0x73c   :  { %3146 = vst [vmem:[%s5671_s6 + $0x1f0] sm:$0xff] %v3696_v30  ;;  %v3697_v34 = vadd.f32 %v5377_v21, %v3080_v33  ;;  %v3082_v35 = vpop.f32.mrb[191].mxu0 }
 0x73e   :  { %3147 = vst [vmem:[%s5671_s6 + $0x1f8] sm:$0xff] %v3697_v34 }

</bundles_post_ra>
